<compile_context>
chip_gen: v7x
topology: tpu7x:2x2x1
jax: 0.10.0
libtpu: 0.0.40
codegen_flags: <defaults>
</compile_context>

<pallas_src>
import functools

import numpy as np
import jax
import jax.numpy as jnp
from jax.experimental import pallas as pl
from jax.experimental.pallas import tpu as pltpu


# Network constants (LeNet on 32x32 single-channel input).
C1, C2 = 6, 16            # conv output channels
H0 = 32                   # input spatial size
H1 = H0 - 2               # 30 : conv1 output size
P1 = H1 // 2              # 15 : pool1 output size
H2 = P1 - 2               # 13 : conv2 output size
P2 = H2 // 2              # 6  : pool2 output size (floor mode)
F1, F2, F3 = 120, 84, 10  # fc sizes


# ---------------------------------------------------------------------------
# Host-side constant builders (pure layout, run once outside the jit)
# ---------------------------------------------------------------------------
def _shift_matrices(in_w, out_w, k=3):
    # S[j][x + j, x] = 1  -> turns conv weights into banded matrices.
    s = np.zeros((k, in_w, out_w), np.float32)
    for j in range(k):
        for x in range(out_w):
            s[j, x + j, x] = 1.0
    return s


def _pool_row_selector(n_blocks, in_stride, out_block, parity, n_cols):
    # M[b*out_block + q, b*in_stride + 2q + parity] = 1  (0/1 selection matrix)
    m = np.zeros((n_blocks * out_block, n_cols), np.float32)
    for b in range(n_blocks):
        for q in range(out_block):
            m[b * out_block + q, b * in_stride + 2 * q + parity] = 1.0
    return m


def _pool2_row_selector_hmajor(n_batch, parity, n_cols):
    # M[h*N + n, n*15 + 2h + parity] = 1 : emits pool2 rows in h-major order so
    # fc1 can contract all images at once.  Only 2h+parity <= 11 is picked, so
    # the cross-image garbage rows (y = 13, 14) of a2 stay excluded.
    m = np.zeros((P2 * n_batch, n_cols), np.float32)
    for h in range(P2):
        for n in range(n_batch):
            m[h * n_batch + n, n * P1 + 2 * h + parity] = 1.0
    return m


def _pack_slab(blocks, lane_width, row_align, out_dtype):
    """Stack 2-D blocks into one (rows, lane_width) slab.

    Each block is zero-padded to (slice_rows, slice_cols) inside a reserved
    region of ceil(slice_rows/row_align)*row_align rows, so every block starts
    on a sublane-tile boundary and the kernel can take lane-dense views.
    Returns (slab, {name: (row0, slice_rows, slice_cols)}).
    """
    offs, parts, r0 = {}, [], 0
    for name, arr, srows, scols in blocks:
        arr = np.asarray(arr, np.float32)
        nr, nc = arr.shape
        assert nr <= srows and nc <= scols <= lane_width, (name, arr.shape)
        rres = -(-srows // row_align) * row_align
        buf = np.zeros((rres, lane_width), np.float32)
        buf[:nr, :nc] = arr
        offs[name] = (r0, srows, scols)
        parts.append(buf)
        r0 += rres
    slab = np.concatenate(parts, axis=0)
    pad = (-slab.shape[0]) % 8
    if pad:
        slab = np.concatenate([slab, np.zeros((pad, lane_width), np.float32)], 0)
    return jnp.asarray(slab, out_dtype), offs


# ---------------------------------------------------------------------------
# The fused Pallas kernel (whole forward pass, 3 inputs, everything in VMEM)
# ---------------------------------------------------------------------------
def _lenet_kernel(x_ref, w_ref, b_ref, o_ref, *, n_batch, woff, boff):
    bf16 = jnp.bfloat16
    dot = functools.partial(jnp.dot, preferred_element_type=jnp.float32)

    def W(name):                                   # bf16 weight/selector view
        r0, nr, nc = woff[name]
        return w_ref[r0:r0 + nr, 0:nc]

    def B(name):                                   # f32 bias row view
        r0, nr, nc = boff[name]
        return b_ref[r0:r0 + nr, 0:nc]

    rows1 = n_batch * H0 - 2                       # conv1 rows (incl. garbage)
    rows2 = n_batch * P1 - 2                       # conv2 rows (incl. garbage)

    # ---- conv1 + bias + relu : rows (n*32 + y), cols (oc*30 + x), lane-padded
    x2d = x_ref[...]
    a1 = dot(x2d[0:rows1, :].astype(bf16), W("bb1_0"))
    a1 = a1 + dot(x2d[1:1 + rows1, :].astype(bf16), W("bb1_1"))
    a1 = a1 + dot(x2d[2:2 + rows1, :].astype(bf16), W("bb1_2"))
    a1 = jnp.maximum(a1 + B("bc1"), 0.0)                        # (N*32-2, 256)

    # ---- pool1 (2x2 / stride 2) via exact 0/1 selection matmuls -------------
    a1b = a1.astype(bf16)
    rm1 = jnp.maximum(dot(W("r1e"), a1b), dot(W("r1o"), a1b))   # (N*15, 256)
    rm1b = rm1.astype(bf16)
    p1 = jnp.maximum(dot(rm1b, W("c1e")), dot(rm1b, W("c1o")))  # (N*15, 128)

    # ---- conv2 + bias + relu : input channels folded into K (3 matmuls) -----
    p1b = p1.astype(bf16)
    a2 = dot(p1b[0:rows2, :], W("bb2_0"))
    a2 = a2 + dot(p1b[1:1 + rows2, :], W("bb2_1"))
    a2 = a2 + dot(p1b[2:2 + rows2, :], W("bb2_2"))
    a2 = jnp.maximum(a2 + B("bc2"), 0.0)                        # (N*15-2, 256)

    # ---- pool2 (floor mode 13 -> 6); rows come out h-major (h*N + n) --------
    a2b = a2.astype(bf16)
    rm2 = jnp.maximum(dot(W("r2e"), a2b), dot(W("r2o"), a2b))   # (6*N, 256)
    rm2b = rm2.astype(bf16)
    p2 = jnp.maximum(dot(rm2b, W("c2e")), dot(rm2b, W("c2o")))  # (6*N, 128)

    # ---- fc1 over the whole batch at once, then fc2, fc3, one store ---------
    p2b = p2.astype(bf16)
    acc = dot(p2b[0:n_batch, :], W("w1m_0"))
    for h in range(1, P2):
        acc = acc + dot(p2b[h * n_batch:(h + 1) * n_batch, :], W("w1m_%d" % h))
    y = jnp.maximum(acc + B("b1"), 0.0)                          # (N, 128)
    y = jnp.maximum(dot(y.astype(bf16), W("w2")) + B("b2"), 0.0)  # (N, 128)
    y = dot(y.astype(bf16), W("w3")) + B("b3")                   # (N, 128)
    o_ref[...] = y.astype(o_ref.dtype)


# ---------------------------------------------------------------------------
# One-time host-side weight preprocessing + slab packing
# ---------------------------------------------------------------------------
def _prepare_constants(params, n_batch):
    cw1 = np.asarray(params["conv1_w"], np.float32)[:, 0]       # (6, 3, 3)
    cb1 = np.asarray(params["conv1_b"], np.float32)
    cw2 = np.asarray(params["conv2_w"], np.float32)             # (16, 6, 3, 3)
    cb2 = np.asarray(params["conv2_b"], np.float32)
    f1w = np.asarray(params["fc1_w"], np.float32)               # (576, 120)
    f2w = np.asarray(params["fc2_w"], np.float32)
    f3w = np.asarray(params["fc3_w"], np.float32)

    # Banded conv weights ("im2col moved to the weights").
    s1 = _shift_matrices(H0, H1)                                # (3, 32, 30)
    bb1 = np.einsum("oij,jab->iaob", cw1, s1).reshape(3, H0, C1 * H1)
    s2 = _shift_matrices(P1, H2)                                # (3, 15, 13)
    bb2 = np.einsum("ocij,jab->icaob", cw2, s2).reshape(3, C1 * P1, C2 * H2)
    bc1 = np.repeat(cb1, H1)[None, :]                           # (1, 180)
    bc2 = np.repeat(cb2, H2)[None, :]                           # (1, 208)

    # fc1 weight regrouped per pooled row h (matches the h-major pool2 rows).
    w1m = f1w.reshape(C2, P2, P2, F1).transpose(1, 0, 2, 3).reshape(
        P2, C2 * P2, F1)                                        # (6, 96, 120)

    # 0/1 pooling selection matrices.
    rows1 = n_batch * H0 - 2
    rows2 = n_batch * P1 - 2
    r1e = _pool_row_selector(n_batch, H0, P1, 0, rows1)         # (N*15, 62)
    r1o = _pool_row_selector(n_batch, H0, P1, 1, rows1)
    c1e = _pool_row_selector(C1, H1, P1, 0, C1 * H1).T          # (180, 90)
    c1o = _pool_row_selector(C1, H1, P1, 1, C1 * H1).T
    r2e = _pool2_row_selector_hmajor(n_batch, 0, rows2)         # (6*N, 28)
    r2o = _pool2_row_selector_hmajor(n_batch, 1, rows2)
    c2e = _pool_row_selector(C2, H2, P2, 0, C2 * H2).T          # (208, 96)
    c2o = _pool_row_selector(C2, H2, P2, 1, C2 * H2).T

    # One bf16 slab holding every matmul operand, blocks zero-padded so the
    # kernel slices lane-dense (128 / 256 wide) views.
    wblocks = [("bb1_%d" % i, bb1[i], H0, 256) for i in range(3)]
    wblocks += [("bb2_%d" % i, bb2[i], 128, 256) for i in range(3)]
    wblocks += [("w1m_%d" % h, w1m[h], 128, 128) for h in range(P2)]
    wblocks += [
        ("w2", f2w, 128, 128),
        ("w3", f3w, 128, 128),
        ("r1e", r1e, n_batch * P1, rows1),
        ("r1o", r1o, n_batch * P1, rows1),
        ("c1e", c1e, 256, 128),
        ("c1o", c1o, 256, 128),
        ("r2e", r2e, P2 * n_batch, rows2),
        ("r2o", r2o, P2 * n_batch, rows2),
        ("c2e", c2e, 256, 128),
        ("c2o", c2o, 256, 128),
    ]
    wslab, woff = _pack_slab(wblocks, lane_width=256, row_align=8,
                             out_dtype=jnp.bfloat16)

    # One small f32 slab for the biases (added onto the f32 accumulators).
    bblocks = [
        ("bc1", bc1, 1, 256),
        ("bc2", bc2, 1, 256),
        ("b1", np.asarray(params["fc1_b"], np.float32)[None, :], 1, 128),
        ("b2", np.asarray(params["fc2_b"], np.float32)[None, :], 1, 128),
        ("b3", np.asarray(params["fc3_b"], np.float32)[None, :], 1, 128),
    ]
    bslab, boff = _pack_slab(bblocks, lane_width=256, row_align=1,
                             out_dtype=jnp.float32)
    return wslab, woff, bslab, boff


def make_forward(params, n_batch):
    """Build a jitted forward(x) for NCHW input x of shape (n_batch,1,32,32)."""
    wslab, woff, bslab, boff = _prepare_constants(params, n_batch)
    kernel = functools.partial(_lenet_kernel, n_batch=n_batch,
                               woff=woff, boff=boff)
    vmem = pl.BlockSpec(memory_space=pltpu.MemorySpace.VMEM)

    def fwd(x, wslab, bslab):
        assert x.shape == (n_batch, 1, H0, H0), x.shape
        x2d = x.reshape(n_batch * H0, H0)
        out = pl.pallas_call(
            kernel,
            out_shape=jax.ShapeDtypeStruct((n_batch, 128), jnp.float32),
            in_specs=[vmem, vmem, vmem],
            out_specs=vmem,
        )(x2d, wslab, bslab)
        return out[:, :F3]          # padded output columns 10..127 are zero

    fwd_jit = jax.jit(fwd)
    return lambda x: fwd_jit(x, wslab, bslab)


# ---------------------------------------------------------------------------
# Pure-XLA reference (mirrors Net.forward) for a runtime sanity check
# ---------------------------------------------------------------------------
def _ref_pool(x):
    ho, wo = x.shape[2] // 2, x.shape[3] // 2
    xt = x[:, :, : 2 * ho, : 2 * wo]
    return jnp.maximum(
        jnp.maximum(xt[:, :, 0::2, 0::2], xt[:, :, 0::2, 1::2]),
        jnp.maximum(xt[:, :, 1::2, 0::2], xt[:, :, 1::2, 1::2]))


def net_forward_reference(params, x):
    dn = ("NCHW", "OIHW", "NCHW")
    y = jax.lax.conv_general_dilated(x, params["conv1_w"], (1, 1), "VALID",
                                     dimension_numbers=dn)
    y = _ref_pool(jax.nn.relu(y + params["conv1_b"][None, :, None, None]))
    y = jax.lax.conv_general_dilated(y, params["conv2_w"], (1, 1), "VALID",
                                     dimension_numbers=dn)
    y = _ref_pool(jax.nn.relu(y + params["conv2_b"][None, :, None, None]))
    y = y.reshape(y.shape[0], -1)
    y = jax.nn.relu(y @ params["fc1_w"] + params["fc1_b"])
    y = jax.nn.relu(y @ params["fc2_w"] + params["fc2_b"])
    return y @ params["fc3_w"] + params["fc3_b"]


# ---------------------------------------------------------------------------
# Parameters (deterministic synthetic init, PyTorch-style uniform bounds)
# ---------------------------------------------------------------------------
def init_params(key):
    ks = jax.random.split(key, 10)

    def u(k, shape, fan_in):
        bound = 1.0 / jnp.sqrt(jnp.float32(fan_in))
        return jax.random.uniform(k, shape, jnp.float32, -bound, bound)

    return {
        "conv1_w": u(ks[0], (6, 1, 3, 3), 1 * 3 * 3),
        "conv1_b": u(ks[1], (6,), 1 * 3 * 3),
        "conv2_w": u(ks[2], (16, 6, 3, 3), 6 * 3 * 3),
        "conv2_b": u(ks[3], (16,), 6 * 3 * 3),
        "fc1_w": u(ks[4], (16 * 6 * 6, 120), 16 * 6 * 6),   # stored (in, out)
        "fc1_b": u(ks[5], (120,), 16 * 6 * 6),
        "fc2_w": u(ks[6], (120, 84), 120),
        "fc2_b": u(ks[7], (84,), 120),
        "fc3_w": u(ks[8], (84, 10), 84),
        "fc3_b": u(ks[9], (10,), 84),
    }


if __name__ == "__main__":
    key = jax.random.PRNGKey(0)
    pkey, xkey = jax.random.split(key)
    params = init_params(pkey)
    # LeNet requires 32x32 single-channel input so fc1 sees 16*6*6 features.
    x = jax.random.normal(xkey, (2, 1, 32, 32), dtype=jnp.float32)

    forward = make_forward(params, n_batch=2)
    out = jax.block_until_ready(forward(x))
    assert out.shape == (2, 10), out.shape
    assert out.dtype == jnp.float32

    ref = jax.block_until_ready(jax.jit(net_forward_reference)(params, x))
    # bf16 MXU operands (f32 accumulation) -> tolerance loosened vs pure f32.
    max_err = float(jnp.max(jnp.abs(out - ref)))
    assert max_err < 3e-2, f"kernel deviates from XLA reference: {max_err}"
    print("KERNEL_OK")
</pallas_src>

<mosaic_0001>
module attributes {stable_mosaic.version = 11 : i64} {
  func.func @_lenet_kernel(%arg0: memref<64x32xf32, #tpu.memory_space<vmem>>, %arg1: memref<2624x256xbf16, #tpu.memory_space<vmem>>, %arg2: memref<8x256xf32, #tpu.memory_space<vmem>>, %arg3: memref<2x128xf32, #tpu.memory_space<vmem>>) attributes {dimension_semantics = [], scalar_prefetch = 0 : i64, scratch_operands = 0 : i64, tpu.core_type = #tpu.core_type<tc>} {
    %c0 = arith.constant 0 : index
    %c0_0 = arith.constant 0 : index
    %0 = vector.load %arg0[%c0, %c0_0] : memref<64x32xf32, #tpu.memory_space<vmem>>, vector<64x32xf32>
    %1 = vector.extract_strided_slice %0 {offsets = [0, 0], sizes = [62, 32], strides = [1, 1]} : vector<64x32xf32> to vector<62x32xf32>
    %2 = arith.truncf %1 : vector<62x32xf32> to vector<62x32xbf16>
    %c0_1 = arith.constant 0 : index
    %c0_2 = arith.constant 0 : index
    %3 = vector.load %arg1[%c0_1, %c0_2] : memref<2624x256xbf16, #tpu.memory_space<vmem>>, vector<32x256xbf16>
    %cst = arith.constant dense<0.000000e+00> : vector<62x256xf32>
    %4 = tpu.matmul %2, %3, %cst {dimension_numbers = #tpu.dot_dimension_numbers<[1], [0], [0], [1], [0, 0, 1, 1], [], []>} : vector<62x32xbf16>, vector<32x256xbf16>, vector<62x256xf32> -> vector<62x256xf32>
    %5 = vector.extract_strided_slice %0 {offsets = [1, 0], sizes = [62, 32], strides = [1, 1]} : vector<64x32xf32> to vector<62x32xf32>
    %6 = arith.truncf %5 : vector<62x32xf32> to vector<62x32xbf16>
    %c32 = arith.constant 32 : index
    %c0_3 = arith.constant 0 : index
    %7 = vector.load %arg1[%c32, %c0_3] : memref<2624x256xbf16, #tpu.memory_space<vmem>>, vector<32x256xbf16>
    %cst_4 = arith.constant dense<0.000000e+00> : vector<62x256xf32>
    %8 = tpu.matmul %6, %7, %cst_4 {dimension_numbers = #tpu.dot_dimension_numbers<[1], [0], [0], [1], [0, 0, 1, 1], [], []>} : vector<62x32xbf16>, vector<32x256xbf16>, vector<62x256xf32> -> vector<62x256xf32>
    %9 = arith.addf %4, %8 : vector<62x256xf32>
    %10 = vector.extract_strided_slice %0 {offsets = [2, 0], sizes = [62, 32], strides = [1, 1]} : vector<64x32xf32> to vector<62x32xf32>
    %11 = arith.truncf %10 : vector<62x32xf32> to vector<62x32xbf16>
    %c64 = arith.constant 64 : index
    %c0_5 = arith.constant 0 : index
    %12 = vector.load %arg1[%c64, %c0_5] : memref<2624x256xbf16, #tpu.memory_space<vmem>>, vector<32x256xbf16>
    %cst_6 = arith.constant dense<0.000000e+00> : vector<62x256xf32>
    %13 = tpu.matmul %11, %12, %cst_6 {dimension_numbers = #tpu.dot_dimension_numbers<[1], [0], [0], [1], [0, 0, 1, 1], [], []>} : vector<62x32xbf16>, vector<32x256xbf16>, vector<62x256xf32> -> vector<62x256xf32>
    %14 = arith.addf %9, %13 : vector<62x256xf32>
    %c0_7 = arith.constant 0 : index
    %c0_8 = arith.constant 0 : index
    %15 = vector.load %arg2[%c0_7, %c0_8] : memref<8x256xf32, #tpu.memory_space<vmem>>, vector<1x256xf32>
    %16 = vector.broadcast %15 : vector<1x256xf32> to vector<62x256xf32>
    %17 = arith.addf %14, %16 : vector<62x256xf32>
    %cst_9 = arith.constant 0.000000e+00 : f32
    %18 = vector.broadcast %cst_9 : f32 to vector<62x256xf32>
    %19 = arith.maximumf %17, %18 : vector<62x256xf32>
    %20 = arith.truncf %19 : vector<62x256xf32> to vector<62x256xbf16>
    %c1504 = arith.constant 1504 : index
    %c0_10 = arith.constant 0 : index
    %21 = vector.load %arg1[%c1504, %c0_10] : memref<2624x256xbf16, #tpu.memory_space<vmem>>, vector<30x62xbf16>
    %cst_11 = arith.constant dense<0.000000e+00> : vector<30x256xf32>
    %22 = tpu.matmul %21, %20, %cst_11 {dimension_numbers = #tpu.dot_dimension_numbers<[1], [0], [0], [1], [0, 0, 1, 1], [], []>} : vector<30x62xbf16>, vector<62x256xbf16>, vector<30x256xf32> -> vector<30x256xf32>
    %c1536 = arith.constant 1536 : index
    %c0_12 = arith.constant 0 : index
    %23 = vector.load %arg1[%c1536, %c0_12] : memref<2624x256xbf16, #tpu.memory_space<vmem>>, vector<30x62xbf16>
    %cst_13 = arith.constant dense<0.000000e+00> : vector<30x256xf32>
    %24 = tpu.matmul %23, %20, %cst_13 {dimension_numbers = #tpu.dot_dimension_numbers<[1], [0], [0], [1], [0, 0, 1, 1], [], []>} : vector<30x62xbf16>, vector<62x256xbf16>, vector<30x256xf32> -> vector<30x256xf32>
    %25 = arith.maximumf %22, %24 : vector<30x256xf32>
    %26 = arith.truncf %25 : vector<30x256xf32> to vector<30x256xbf16>
    %c1568 = arith.constant 1568 : index
    %c0_14 = arith.constant 0 : index
    %27 = vector.load %arg1[%c1568, %c0_14] : memref<2624x256xbf16, #tpu.memory_space<vmem>>, vector<256x128xbf16>
    %cst_15 = arith.constant dense<0.000000e+00> : vector<30x128xf32>
    %28 = tpu.matmul %26, %27, %cst_15 {dimension_numbers = #tpu.dot_dimension_numbers<[1], [0], [0], [1], [0, 0, 1, 1], [], []>} : vector<30x256xbf16>, vector<256x128xbf16>, vector<30x128xf32> -> vector<30x128xf32>
    %c1824 = arith.constant 1824 : index
    %c0_16 = arith.constant 0 : index
    %29 = vector.load %arg1[%c1824, %c0_16] : memref<2624x256xbf16, #tpu.memory_space<vmem>>, vector<256x128xbf16>
    %cst_17 = arith.constant dense<0.000000e+00> : vector<30x128xf32>
    %30 = tpu.matmul %26, %29, %cst_17 {dimension_numbers = #tpu.dot_dimension_numbers<[1], [0], [0], [1], [0, 0, 1, 1], [], []>} : vector<30x256xbf16>, vector<256x128xbf16>, vector<30x128xf32> -> vector<30x128xf32>
    %31 = arith.maximumf %28, %30 : vector<30x128xf32>
    %32 = arith.truncf %31 : vector<30x128xf32> to vector<30x128xbf16>
    %33 = vector.extract_strided_slice %32 {offsets = [0, 0], sizes = [28, 128], strides = [1, 1]} : vector<30x128xbf16> to vector<28x128xbf16>
    %c96 = arith.constant 96 : index
    %c0_18 = arith.constant 0 : index
    %34 = vector.load %arg1[%c96, %c0_18] : memref<2624x256xbf16, #tpu.memory_space<vmem>>, vector<128x256xbf16>
    %cst_19 = arith.constant dense<0.000000e+00> : vector<28x256xf32>
    %35 = tpu.matmul %33, %34, %cst_19 {dimension_numbers = #tpu.dot_dimension_numbers<[1], [0], [0], [1], [0, 0, 1, 1], [], []>} : vector<28x128xbf16>, vector<128x256xbf16>, vector<28x256xf32> -> vector<28x256xf32>
    %36 = vector.extract_strided_slice %32 {offsets = [1, 0], sizes = [28, 128], strides = [1, 1]} : vector<30x128xbf16> to vector<28x128xbf16>
    %c224 = arith.constant 224 : index
    %c0_20 = arith.constant 0 : index
    %37 = vector.load %arg1[%c224, %c0_20] : memref<2624x256xbf16, #tpu.memory_space<vmem>>, vector<128x256xbf16>
    %cst_21 = arith.constant dense<0.000000e+00> : vector<28x256xf32>
    %38 = tpu.matmul %36, %37, %cst_21 {dimension_numbers = #tpu.dot_dimension_numbers<[1], [0], [0], [1], [0, 0, 1, 1], [], []>} : vector<28x128xbf16>, vector<128x256xbf16>, vector<28x256xf32> -> vector<28x256xf32>
    %39 = arith.addf %35, %38 : vector<28x256xf32>
    %40 = vector.extract_strided_slice %32 {offsets = [2, 0], sizes = [28, 128], strides = [1, 1]} : vector<30x128xbf16> to vector<28x128xbf16>
    %c352 = arith.constant 352 : index
    %c0_22 = arith.constant 0 : index
    %41 = vector.load %arg1[%c352, %c0_22] : memref<2624x256xbf16, #tpu.memory_space<vmem>>, vector<128x256xbf16>
    %cst_23 = arith.constant dense<0.000000e+00> : vector<28x256xf32>
    %42 = tpu.matmul %40, %41, %cst_23 {dimension_numbers = #tpu.dot_dimension_numbers<[1], [0], [0], [1], [0, 0, 1, 1], [], []>} : vector<28x128xbf16>, vector<128x256xbf16>, vector<28x256xf32> -> vector<28x256xf32>
    %43 = arith.addf %39, %42 : vector<28x256xf32>
    %c1 = arith.constant 1 : index
    %c0_24 = arith.constant 0 : index
    %44 = vector.load %arg2[%c1, %c0_24] : memref<8x256xf32, #tpu.memory_space<vmem>>, vector<1x256xf32>
    %45 = vector.broadcast %44 : vector<1x256xf32> to vector<28x256xf32>
    %46 = arith.addf %43, %45 : vector<28x256xf32>
    %cst_25 = arith.constant 0.000000e+00 : f32
    %47 = vector.broadcast %cst_25 : f32 to vector<28x256xf32>
    %48 = arith.maximumf %46, %47 : vector<28x256xf32>
    %49 = arith.truncf %48 : vector<28x256xf32> to vector<28x256xbf16>
    %c2080 = arith.constant 2080 : index
    %c0_26 = arith.constant 0 : index
    %50 = vector.load %arg1[%c2080, %c0_26] : memref<2624x256xbf16, #tpu.memory_space<vmem>>, vector<12x28xbf16>
    %cst_27 = arith.constant dense<0.000000e+00> : vector<12x256xf32>
    %51 = tpu.matmul %50, %49, %cst_27 {dimension_numbers = #tpu.dot_dimension_numbers<[1], [0], [0], [1], [0, 0, 1, 1], [], []>} : vector<12x28xbf16>, vector<28x256xbf16>, vector<12x256xf32> -> vector<12x256xf32>
    %c2096 = arith.constant 2096 : index
    %c0_28 = arith.constant 0 : index
    %52 = vector.load %arg1[%c2096, %c0_28] : memref<2624x256xbf16, #tpu.memory_space<vmem>>, vector<12x28xbf16>
    %cst_29 = arith.constant dense<0.000000e+00> : vector<12x256xf32>
    %53 = tpu.matmul %52, %49, %cst_29 {dimension_numbers = #tpu.dot_dimension_numbers<[1], [0], [0], [1], [0, 0, 1, 1], [], []>} : vector<12x28xbf16>, vector<28x256xbf16>, vector<12x256xf32> -> vector<12x256xf32>
    %54 = arith.maximumf %51, %53 : vector<12x256xf32>
    %55 = arith.truncf %54 : vector<12x256xf32> to vector<12x256xbf16>
    %c2112 = arith.constant 2112 : index
    %c0_30 = arith.constant 0 : index
    %56 = vector.load %arg1[%c2112, %c0_30] : memref<2624x256xbf16, #tpu.memory_space<vmem>>, vector<256x128xbf16>
    %cst_31 = arith.constant dense<0.000000e+00> : vector<12x128xf32>
    %57 = tpu.matmul %55, %56, %cst_31 {dimension_numbers = #tpu.dot_dimension_numbers<[1], [0], [0], [1], [0, 0, 1, 1], [], []>} : vector<12x256xbf16>, vector<256x128xbf16>, vector<12x128xf32> -> vector<12x128xf32>
    %c2368 = arith.constant 2368 : index
    %c0_32 = arith.constant 0 : index
    %58 = vector.load %arg1[%c2368, %c0_32] : memref<2624x256xbf16, #tpu.memory_space<vmem>>, vector<256x128xbf16>
    %cst_33 = arith.constant dense<0.000000e+00> : vector<12x128xf32>
    %59 = tpu.matmul %55, %58, %cst_33 {dimension_numbers = #tpu.dot_dimension_numbers<[1], [0], [0], [1], [0, 0, 1, 1], [], []>} : vector<12x256xbf16>, vector<256x128xbf16>, vector<12x128xf32> -> vector<12x128xf32>
    %60 = arith.maximumf %57, %59 : vector<12x128xf32>
    %61 = arith.truncf %60 : vector<12x128xf32> to vector<12x128xbf16>
    %62 = vector.extract_strided_slice %61 {offsets = [0, 0], sizes = [2, 128], strides = [1, 1]} : vector<12x128xbf16> to vector<2x128xbf16>
    %c480 = arith.constant 480 : index
    %c0_34 = arith.constant 0 : index
    %63 = vector.load %arg1[%c480, %c0_34] : memref<2624x256xbf16, #tpu.memory_space<vmem>>, vector<128x128xbf16>
    %cst_35 = arith.constant dense<0.000000e+00> : vector<2x128xf32>
    %64 = tpu.matmul %62, %63, %cst_35 {dimension_numbers = #tpu.dot_dimension_numbers<[1], [0], [0], [1], [0, 0, 1, 1], [], []>} : vector<2x128xbf16>, vector<128x128xbf16>, vector<2x128xf32> -> vector<2x128xf32>
    %65 = vector.extract_strided_slice %61 {offsets = [2, 0], sizes = [2, 128], strides = [1, 1]} : vector<12x128xbf16> to vector<2x128xbf16>
    %c608 = arith.constant 608 : index
    %c0_36 = arith.constant 0 : index
    %66 = vector.load %arg1[%c608, %c0_36] : memref<2624x256xbf16, #tpu.memory_space<vmem>>, vector<128x128xbf16>
    %cst_37 = arith.constant dense<0.000000e+00> : vector<2x128xf32>
    %67 = tpu.matmul %65, %66, %cst_37 {dimension_numbers = #tpu.dot_dimension_numbers<[1], [0], [0], [1], [0, 0, 1, 1], [], []>} : vector<2x128xbf16>, vector<128x128xbf16>, vector<2x128xf32> -> vector<2x128xf32>
    %68 = arith.addf %64, %67 : vector<2x128xf32>
    %69 = vector.extract_strided_slice %61 {offsets = [4, 0], sizes = [2, 128], strides = [1, 1]} : vector<12x128xbf16> to vector<2x128xbf16>
    %c736 = arith.constant 736 : index
    %c0_38 = arith.constant 0 : index
    %70 = vector.load %arg1[%c736, %c0_38] : memref<2624x256xbf16, #tpu.memory_space<vmem>>, vector<128x128xbf16>
    %cst_39 = arith.constant dense<0.000000e+00> : vector<2x128xf32>
    %71 = tpu.matmul %69, %70, %cst_39 {dimension_numbers = #tpu.dot_dimension_numbers<[1], [0], [0], [1], [0, 0, 1, 1], [], []>} : vector<2x128xbf16>, vector<128x128xbf16>, vector<2x128xf32> -> vector<2x128xf32>
    %72 = arith.addf %68, %71 : vector<2x128xf32>
    %73 = vector.extract_strided_slice %61 {offsets = [6, 0], sizes = [2, 128], strides = [1, 1]} : vector<12x128xbf16> to vector<2x128xbf16>
    %c864 = arith.constant 864 : index
    %c0_40 = arith.constant 0 : index
    %74 = vector.load %arg1[%c864, %c0_40] : memref<2624x256xbf16, #tpu.memory_space<vmem>>, vector<128x128xbf16>
    %cst_41 = arith.constant dense<0.000000e+00> : vector<2x128xf32>
    %75 = tpu.matmul %73, %74, %cst_41 {dimension_numbers = #tpu.dot_dimension_numbers<[1], [0], [0], [1], [0, 0, 1, 1], [], []>} : vector<2x128xbf16>, vector<128x128xbf16>, vector<2x128xf32> -> vector<2x128xf32>
    %76 = arith.addf %72, %75 : vector<2x128xf32>
    %77 = vector.extract_strided_slice %61 {offsets = [8, 0], sizes = [2, 128], strides = [1, 1]} : vector<12x128xbf16> to vector<2x128xbf16>
    %c992 = arith.constant 992 : index
    %c0_42 = arith.constant 0 : index
    %78 = vector.load %arg1[%c992, %c0_42] : memref<2624x256xbf16, #tpu.memory_space<vmem>>, vector<128x128xbf16>
    %cst_43 = arith.constant dense<0.000000e+00> : vector<2x128xf32>
    %79 = tpu.matmul %77, %78, %cst_43 {dimension_numbers = #tpu.dot_dimension_numbers<[1], [0], [0], [1], [0, 0, 1, 1], [], []>} : vector<2x128xbf16>, vector<128x128xbf16>, vector<2x128xf32> -> vector<2x128xf32>
    %80 = arith.addf %76, %79 : vector<2x128xf32>
    %81 = vector.extract_strided_slice %61 {offsets = [10, 0], sizes = [2, 128], strides = [1, 1]} : vector<12x128xbf16> to vector<2x128xbf16>
    %c1120 = arith.constant 1120 : index
    %c0_44 = arith.constant 0 : index
    %82 = vector.load %arg1[%c1120, %c0_44] : memref<2624x256xbf16, #tpu.memory_space<vmem>>, vector<128x128xbf16>
    %cst_45 = arith.constant dense<0.000000e+00> : vector<2x128xf32>
    %83 = tpu.matmul %81, %82, %cst_45 {dimension_numbers = #tpu.dot_dimension_numbers<[1], [0], [0], [1], [0, 0, 1, 1], [], []>} : vector<2x128xbf16>, vector<128x128xbf16>, vector<2x128xf32> -> vector<2x128xf32>
    %84 = arith.addf %80, %83 : vector<2x128xf32>
    %c2 = arith.constant 2 : index
    %c0_46 = arith.constant 0 : index
    %85 = vector.load %arg2[%c2, %c0_46] : memref<8x256xf32, #tpu.memory_space<vmem>>, vector<1x128xf32>
    %86 = vector.broadcast %85 : vector<1x128xf32> to vector<2x128xf32>
    %87 = arith.addf %84, %86 : vector<2x128xf32>
    %cst_47 = arith.constant 0.000000e+00 : f32
    %88 = vector.broadcast %cst_47 : f32 to vector<2x128xf32>
    %89 = arith.maximumf %87, %88 : vector<2x128xf32>
    %90 = arith.truncf %89 : vector<2x128xf32> to vector<2x128xbf16>
    %c1248 = arith.constant 1248 : index
    %c0_48 = arith.constant 0 : index
    %91 = vector.load %arg1[%c1248, %c0_48] : memref<2624x256xbf16, #tpu.memory_space<vmem>>, vector<128x128xbf16>
    %cst_49 = arith.constant dense<0.000000e+00> : vector<2x128xf32>
    %92 = tpu.matmul %90, %91, %cst_49 {dimension_numbers = #tpu.dot_dimension_numbers<[1], [0], [0], [1], [0, 0, 1, 1], [], []>} : vector<2x128xbf16>, vector<128x128xbf16>, vector<2x128xf32> -> vector<2x128xf32>
    %c3 = arith.constant 3 : index
    %c0_50 = arith.constant 0 : index
    %93 = vector.load %arg2[%c3, %c0_50] : memref<8x256xf32, #tpu.memory_space<vmem>>, vector<1x128xf32>
    %94 = vector.broadcast %93 : vector<1x128xf32> to vector<2x128xf32>
    %95 = arith.addf %92, %94 : vector<2x128xf32>
    %cst_51 = arith.constant 0.000000e+00 : f32
    %96 = vector.broadcast %cst_51 : f32 to vector<2x128xf32>
    %97 = arith.maximumf %95, %96 : vector<2x128xf32>
    %98 = arith.truncf %97 : vector<2x128xf32> to vector<2x128xbf16>
    %c1376 = arith.constant 1376 : index
    %c0_52 = arith.constant 0 : index
    %99 = vector.load %arg1[%c1376, %c0_52] : memref<2624x256xbf16, #tpu.memory_space<vmem>>, vector<128x128xbf16>
    %cst_53 = arith.constant dense<0.000000e+00> : vector<2x128xf32>
    %100 = tpu.matmul %98, %99, %cst_53 {dimension_numbers = #tpu.dot_dimension_numbers<[1], [0], [0], [1], [0, 0, 1, 1], [], []>} : vector<2x128xbf16>, vector<128x128xbf16>, vector<2x128xf32> -> vector<2x128xf32>
    %c4 = arith.constant 4 : index
    %c0_54 = arith.constant 0 : index
    %101 = vector.load %arg2[%c4, %c0_54] : memref<8x256xf32, #tpu.memory_space<vmem>>, vector<1x128xf32>
    %102 = vector.broadcast %101 : vector<1x128xf32> to vector<2x128xf32>
    %103 = arith.addf %100, %102 : vector<2x128xf32>
    %c0_55 = arith.constant 0 : index
    %c0_56 = arith.constant 0 : index
    %104 = vector.load %arg3[%c0_55, %c0_56] : memref<2x128xf32, #tpu.memory_space<vmem>>, vector<2x128xf32>
    tpu.vector_store %arg3[%c0_55, %c0_56], %103 {strides = array<i32>} : memref<2x128xf32, #tpu.memory_space<vmem>>, vector<2x128xf32>,
    return
  }
}

</mosaic_0001>

<bundles_post_ra>
// kernel: fwd.1
= control target key start
LH: loop header
LB: loop body
LE: loop exit
PB: predicated region body
PF: predicated region fallthrough
CT: control target
= control target key end

     0   :  { %8 = vsyncpa [#allocation3], 0  ;;  %s4057_s0 = inlined_call_operand.hbm [shape: f32[64,32], index: 0, kind: input, shape index: {}]   ;;  %s4058_s1 = inlined_call_operand.hbm [shape: bf16[2624,256], index: 1, kind: input, shape index: {}]   ;;  %s4059_s2 = inlined_call_operand.hbm [shape: f32[8,256], index: 2, kind: input, shape index: {}]   ;;  %s4060_s3 = inlined_call_operand.hbm [shape: f32[2,128], index: 3, kind: output, shape index: {}]  }
   0x1   :  { %9 = vsyncpa [#allocation6], 0 }
   0x2   :  { %10 = vsyncpa [#allocation4], 0  ;;  %s3797_s12 = smov [#allocation5]   ;;  %s3798_s14 = smov [#allocation2]  }
   0x3   :  { %s28_s13 = sshll.u32 %s3797_s12, 4  ;;  %s16_s15 = sshll.u32 %s3798_s14, 4  ;;  %s29_s13 = int_to_ptr.vmem [resolvable:$true] %s28_s13  ;;  %s3826_s15 = int_to_ptr.vmem [resolvable:$true] %s16_s15 }
   0x4   :  { %s3703_s18 = scalar_lea.hbm %s4058_s1, 41984 }
   0x5   :  { %p3704_p0 = scmp.ne.s32.totalorder %s4058_s1, %s3703_s18  ;;  %p3707_p1 = scmp.lt.u32.totalorder %s3703_s18, %s4058_s1 }
   0x7   :  { %p3709_p2 = pnand %p3707_p1, %p3704_p0 }
   0x9   :  { %3712 = shalt.err (!%p3709_p2)
}
   0xa   :  { %s3713_s23 = scalar_lea.vmem %s29_s13, 41984  ;;  %p3718_p4 = scmp.lt.s32.totalorder %s29_s13, %s29_s13 }
   0xb   :  { %p3714_p3 = scmp.ne.s32.totalorder %s29_s13, %s3713_s23  ;;  %p3719_p5 = scmp.lt.s32.totalorder %s3713_s23, %s3713_s23 }
   0xd   :  { %p3720_p6 = por %p3719_p5, %p3718_p4 }
   0xf   :  { %p3721_p7 = pnand %p3720_p6, %p3714_p3 }
  0x11   :  { %3724 = shalt.err (!%p3721_p7)
}
  0x12   :  { %s3799_s24 = smov 128   ;;  %s3800_s25 = smov 8  }
  0x13   :  { %34 = dma.hbm_to_vmem [thread:$0]  %s4058_s1, 41984, %s29_s13, [#allocation6], %s3799_s24, %s3799_s24, %s3800_s25  }
  0x14   :  { %s3725_s30 = scalar_lea.hbm %s4057_s0, 1024 }
  0x15   :  { %p3726_p8 = scmp.ne.s32.totalorder %s4057_s0, %s3725_s30  ;;  %p3729_p9 = scmp.lt.u32.totalorder %s3725_s30, %s4057_s0 }
  0x17   :  { %p3731_p10 = pnand %p3729_p9, %p3726_p8 }
  0x19   :  { %3734 = shalt.err (!%p3731_p10)
}
  0x1a   :  { %s3735_s8 = scalar_lea.vmem %s3826_s15, 1024  ;;  %p3740_p12 = scmp.lt.s32.totalorder %s3826_s15, %s3826_s15 }
  0x1b   :  { %p3736_p11 = scmp.ne.s32.totalorder %s3826_s15, %s3735_s8  ;;  %p3741_p13 = scmp.lt.s32.totalorder %s3735_s8, %s3735_s8 }
  0x1d   :  { %p3742_p0 = por %p3741_p13, %p3740_p12 }
  0x1f   :  { %p3743_p1 = pnand %p3742_p0, %p3736_p11 }
  0x21   :  { %3746 = shalt.err (!%p3743_p1)
}
  0x22   :  { %22 = dma.hbm_to_vmem [thread:$0]  %s4057_s0, 1024, %s3826_s15, [#allocation3], %s3799_s24, %s3799_s24, %s3800_s25  }
  0x23   :  { %s3801_s10 = smov [#allocation7]   ;;  %s3747_s14 = scalar_lea.hbm %s4059_s2, 256 }
  0x24   :  { %s41_s11 = sshll.u32 %s3801_s10, 4  ;;  %p3748_p2 = scmp.ne.s32.totalorder %s4059_s2, %s3747_s14  ;;  %s42_s11 = int_to_ptr.vmem [resolvable:$true] %s41_s11 }
  0x25   :  { %p3751_p3 = scmp.lt.u32.totalorder %s3747_s14, %s4059_s2 }
  0x27   :  { %p3753_p4 = pnand %p3751_p3, %p3748_p2 }
  0x29   :  { %3756 = shalt.err (!%p3753_p4)
}
  0x2a   :  { %s3757_s20 = scalar_lea.vmem %s42_s11, 256  ;;  %p3762_p6 = scmp.lt.s32.totalorder %s42_s11, %s42_s11 }
  0x2b   :  { %p3758_p5 = scmp.ne.s32.totalorder %s42_s11, %s3757_s20  ;;  %p3763_p7 = scmp.lt.s32.totalorder %s3757_s20, %s3757_s20 }
  0x2d   :  { %p3764_p8 = por %p3763_p7, %p3762_p6 }
  0x2f   :  { %p3765_p9 = pnand %p3764_p8, %p3758_p5 }
  0x31   :  { %3768 = shalt.err (!%p3765_p9)
}
  0x32   :  { %44 = dma.hbm_to_vmem [thread:$0]  %s4059_s2, 256, %s42_s11, [#allocation6]  }
  0x33   :  { %3791 = dma.done.wait [#allocation3], 1024  }
  0x34   :  { %3792 = vsyncadd [#allocation3], 4294966272 }
  0x35   :  { %3793 = dma.done.wait [#allocation6], 42240  }
  0x36   :  { %3794 = vsyncadd [#allocation6], 4294925056  ;;  %v3802_v0 = vmov 0   ;;  %v3479_v1 = vld [vmem:[#allocation5 + $0x24] ss:$8 sps:$4 sm:$0xff]   ;;  %v57_v7 = vld [vmem:[#allocation2 + $0x10] sm:$0xff]  ;;  %v453_v51 = vlaneseq }
  0x37   :  { %172 = vmatprep.mubr.bf16.mxu0 %v3802_v0  ;;  %563 = vmatprep.mubr.bf16.mxu1 %v3802_v0  ;;  %v3481_v2 = vld [vmem:[#allocation5 + $0x20] ss:$8 sps:$4 sm:$0xff]   ;;  %v3482_v3 = vld [vmem:[#allocation5 + $0x34] ss:$8 sps:$4 sm:$0xff]   ;;  %v3484_v4 = vld [vmem:[#allocation5 + $0x30] ss:$8 sps:$4 sm:$0xff]  }
  0x38   :  { %140 = vmatprep.subr.bf16.mxu0 %v3479_v1  ;;  %v55_v5 = vld [vmem:[#allocation2] sm:$0xff]  ;;  %v56_v6 = vld [vmem:[#allocation2 + $0x8] sm:$0xff]  ;;  %v58_v8 = vld [vmem:[#allocation2 + $0x18] sm:$0xff]  ;;  %vm75_vm0 = vsmask.f32 7424  ;;  %vm127_vm1 = vcmask 261120  }
  0x39   :  { %141 = vmatpush1.bf16.msra.mxu0 %v3481_v2  ;;  %v63_v9 = vpack.c.bf16 %v56_v6, %v55_v5  ;;  %v3871_v10 = vpack.c.bf16 %v58_v8, %v57_v7  ;;  %v3487_v11 = vld [vmem:[#allocation5 + $0x4] ss:$8 sps:$4 sm:$0xff]   ;;  %v61_v18 = vld [vmem:[#allocation2 + $0x30] sm:$0xff]  ;;  %v62_v19 = vld [vmem:[#allocation2 + $0x38] sm:$0xff]  ;;  %vm322_vm2 = vcmask 1046528   ;;  %v3913_v52 = vshrl.u32 %v453_v51, 7 }
  0x3a   :  { %142 = vmatprep.subr.bf16.mxu0 %v3482_v3  ;;  %v59_v12 = vld [vmem:[#allocation2 + $0x20] sm:$0xff]  ;;  %v60_v13 = vld [vmem:[#allocation2 + $0x28] sm:$0xff]  ;;  %v3874_v20 = vpack.c.bf16 %v62_v19, %v61_v18  ;;  %v3490_v33 = vld [vmem:[#allocation5 + $0x14] ss:$8 sps:$4 sm:$0xff]   ;;  %vm517_vm3 = vcmask 506880   ;;  %vm1552_vm4 = vcmask 1045504  }
  0x3b   :  { %v77_v14 = vshrl.u32 %v63_v9, 16  ;;  %v79_v15 = vshll.u32 %v63_v9, 16  ;;  %v84_v16 = vshll.u32 %v3871_v10, 16  ;;  %v65_v17 = vpack.c.bf16 %v60_v13, %v59_v12  ;;  %v3485_v24 = vld [vmem:[#allocation5] ss:$8 sps:$4 sm:$0xff]   ;;  %s3805_s2 = smov [#allocation8]  }
  0x3c   :  { %v88_v25 = vshrl.u32 %v3871_v10, 16  ;;  %v100_v27 = vshll.u32 %v3874_v20, 16  ;;  %v104_v30 = vshrl.u32 %v3874_v20, 16  ;;  %v323_v31 = vrot.slane %v63_v9, 1  ;;  %v3488_v38 = vld [vmem:[#allocation5 + $0x10] ss:$8 sps:$4 sm:$0xff]  }
  0x3d   :  { %143 = vmatpush1.bf16.msra.mxu0 %v3484_v4  ;;  %v81_v21 = vrot.slane %v79_v15, 1  ;;  %v86_v22 = vrot.slane %v84_v16, 1  ;;  %v92_v23 = vshll.u32 %v65_v17, 16  ;;  %v96_v26 = vshrl.u32 %v65_v17, 16  ;;  %v3493_v39 = vld [vmem:[#allocation5 + $0x44] ss:$8 sps:$4 sm:$0xff]  }
  0x3e   :  { %241 = vmatprep.subr.bf16.mxu0 %v3487_v11  ;;  %v102_v32 = vrot.slane %v100_v27, 1  ;;  %v324_v34 = vrot.slane %v3871_v10, 1  ;;  %v326_v35 = vrot.slane %v65_v17, 1  ;;  %v328_v36 = vrot.slane %v3874_v20, 1  ;;  %v3491_v48 = vld [vmem:[#allocation5 + $0x40] ss:$8 sps:$4 sm:$0xff]  }
  0x3f   :  { %v82_v28 = vor.u32 %v81_v21, %v77_v14  ;;  %v94_v29 = vrot.slane %v92_v23, 1  ;;  %v90_v43 = vor.u32 %v88_v25, %v86_v22  ;;  %v3496_v49 = vld [vmem:[#allocation5 + $0x54] ss:$8 sps:$4 sm:$0xff]   ;;  %v3494_v50 = vld [vmem:[#allocation5 + $0x50] ss:$8 sps:$4 sm:$0xff]   ;;  %v455_v53 = vsub.s32 0, %v3913_v52 }
  0x40   :  { %v325_v40 = vsel %vm322_vm2, %v323_v31, %v324_v34  ;;  %v327_v41 = vsel %vm322_vm2, %v324_v34, %v326_v35  ;;  %v329_v42 = vsel %vm322_vm2, %v326_v35, %v328_v36  ;;  %v106_v47 = vor.u32 %v104_v30, %v102_v32  ;;  %v451_v54 = vld [vmem:[#allocation7] ss:$8 sm:$0x3]  ;;  %s2864_s21 = sshll.u32 %s3805_s2, 4  ;;  %s2865_s21 = int_to_ptr.vmem [resolvable:$true] %s2864_s21 }
  0x41   :  { %v87_v37 = vsel %vm75_vm0, %v82_v28, %v86_v22  ;;  %v95_v44 = vsel %vm75_vm0, %v90_v43, %v94_v29  ;;  %v98_v45 = vor.u32 %v96_v26, %v94_v29  ;;  %v459_v55 = vsub.s32 1, %v3913_v52  ;;  %s3769_s22 = scalar_lea.vmem %s2865_s21, 32  ;;  %p3774_p11 = scmp.lt.s32.totalorder %s2865_s21, %s2865_s21 }
  0x42   :  { %2878 = vmatmul.mubr.msk.bf16.vlgmr.msra.gmra.mrb[0].mxu0 %vm127_vm1, %v87_v37  ;;  %v456_v56 = vrot.slane %v451_v54, %v455_v53  ;;  %vm1548_vm5 = vcmask 228352   ;;  %vm3804_vm6 = vmmov 0   ;;  %p3770_p10 = scmp.ne.s32.totalorder %s2865_s21, %s3769_s22  ;;  %p3775_p12 = scmp.lt.s32.totalorder %s3769_s22, %s3769_s22 }
  0x43   :  { %242 = vmatpush1.bf16.msra.mxu0 %v3485_v24  ;;  %182 = vmatprep.mubr.bf16.mxu0 %v3802_v0  ;;  %v103_v46 = vsel %vm75_vm0, %v98_v45, %v102_v32  ;;  %v460_v57 = vrot.slane %v451_v54, %v459_v55  ;;  %v3497_v54 = vld [vmem:[#allocation5 + $0x5e0] ss:$8 sps:$4 sm:$0xff]  }
  0x44   :  { %243 = vmatprep.subr.bf16.mxu0 %v3490_v33  ;;  %p3776_p13 = por %p3775_p12, %p3774_p11 }
  0x46   :  { %p3777_p0 = pnand %p3776_p13, %p3770_p10 }
  0x47   :  { %244 = vmatpush1.bf16.msra.mxu0 %v3488_v38 }
  0x48   :  { %362 = vmatprep.subr.bf16.mxu0 %v3493_v39 }
  0x4a   :  { %2879 = vmatmul.mubr.msk.bf16.gmra.mrb[4].mxu0 %vm127_vm1, %v95_v44 }
  0x4b   :  { %192 = vmatprep.mubr.bf16.mxu0 %v3802_v0 }
  0x52   :  { %2880 = vmatmul.mubr.msk.bf16.gmra.mrb[8].mxu0 %vm127_vm1, %v103_v46 }
  0x53   :  { %202 = vmatprep.mubr.bf16.mxu0 %v3802_v0 }
  0x5a   :  { %2881 = vmatmul.mubr.msk.bf16.gmra.mrb[12].mxu0 %vm127_vm1, %v106_v47 }
  0x5b   :  { %273 = vmatprep.mubr.bf16.mxu0 %v3802_v0 }
  0x62   :  { %2886 = vmatmul.mubr.msk.bf16.vlgmr.msra.gmra.mrb[0].mxu0 %vm127_vm1, %v63_v9 }
  0x63   :  { %363 = vmatpush1.bf16.msra.mxu0 %v3491_v48  ;;  %283 = vmatprep.mubr.bf16.mxu0 %v3802_v0 }
  0x64   :  { %364 = vmatprep.subr.bf16.mxu0 %v3496_v49 }
  0x67   :  { %365 = vmatpush1.bf16.msra.mxu0 %v3494_v50 }
  0x6a   :  { %2887 = vmatmul.mubr.msk.bf16.gmra.mrb[4].mxu0 %vm127_vm1, %v3871_v10 }
  0x6b   :  { %293 = vmatprep.mubr.bf16.mxu0 %v3802_v0 }
  0x72   :  { %2888 = vmatmul.mubr.msk.bf16.gmra.mrb[8].mxu0 %vm127_vm1, %v65_v17 }
  0x73   :  { %303 = vmatprep.mubr.bf16.mxu0 %v3802_v0 }
  0x7a   :  { %2889 = vmatmul.mubr.msk.bf16.gmra.mrb[12].mxu0 %vm127_vm1, %v3874_v20 }
  0x7b   :  { %394 = vmatprep.mubr.bf16.mxu0 %v3802_v0 }
  0x82   :  { %2894 = vmatmul.mubr.msk.bf16.vlgmr.msra.gmra.mrb[0].mxu0 %vm127_vm1, %v325_v40 }
  0x83   :  { %404 = vmatprep.mubr.bf16.mxu0 %v3802_v0 }
  0x8a   :  { %2895 = vmatmul.mubr.msk.bf16.gmra.mrb[4].mxu0 %vm127_vm1, %v327_v41 }
  0x8b   :  { %414 = vmatprep.mubr.bf16.mxu0 %v3802_v0 }
  0x92   :  { %2896 = vmatmul.mubr.msk.bf16.gmra.mrb[8].mxu0 %vm127_vm1, %v329_v42 }
  0x93   :  { %424 = vmatprep.mubr.bf16.mxu0 %v3802_v0 }
  0x9a   :  { %2897 = vmatmul.mubr.msk.bf16.gmra.mrb[12].mxu0 %vm127_vm1, %v328_v36 }
  0x9b   :  { %1190 = vmatprep.mubr.bf16.mxu0 %v3802_v0 }
 0x155   :  { %v396_v58 = vpop.f32.mrb[0].mxu0 }
 0x156   :  { %v463_v59 = vadd.f32 %v456_v56, %v396_v58  ;;  %v398_v60 = vpop.f32.mrb[1].mxu0  ;;  %v3499_v58 = vld [vmem:[#allocation5 + $0x600] ss:$8 sps:$4 sm:$0xff]  }
 0x157   :  { %v464_v61 = vadd.f32 %v460_v57, %v398_v60  ;;  %v400_v62 = vpop.f32.mrb[2].mxu0  ;;  %v3503_v60 = vld [vmem:[#allocation5 + $0x6b0] ss:$8 sps:$4 sm:$0xff]  }
 0x158   :  { %v465_v63 = vadd.f32 %v456_v56, %v400_v62  ;;  %v402_v1 = vpop.f32.mrb[3].mxu0  ;;  %v479_v3 = vmax.f32 %v463_v59, 0.0  ;;  %v3502_v59 = vld [vmem:[#allocation5 + $0x620] ss:$8 sps:$4 sm:$0xff]  }
 0x159   :  { %v466_v2 = vadd.f32 %v460_v57, %v402_v1  ;;  %v480_v5 = vmax.f32 %v464_v61, 0.0  ;;  %v3504_v61 = vld [vmem:[#allocation5 + $0x630] ss:$8 sps:$4 sm:$0xff]   ;;  %v3506_v1 = vld [vmem:[#allocation5 + $0x640] ss:$8 sps:$4 sm:$0xff]  }
 0x15a   :  { %v481_v4 = vmax.f32 %v465_v63, 0.0  ;;  %v3500_v62 = vld [vmem:[#allocation5 + $0x610] ss:$8 sps:$4 sm:$0x7f]   ;;  %v3505_v63 = vld [vmem:[#allocation5 + $0x6c0] ss:$8 sps:$4 sm:$0xff]  }
 0x15b   :  { %v482_v6 = vmax.f32 %v466_v2, 0.0  ;;  %v3507_v2 = vld [vmem:[#allocation5 + $0x6d0] ss:$8 sps:$4 sm:$0xff]  }
 0x15c   :  { %v495_v7 = vpack.c.bf16 %v481_v4, %v479_v3  ;;  %v3508_v3 = vld [vmem:[#allocation5 + $0x650] ss:$8 sps:$4 sm:$0xff]   ;;  %v3509_v4 = vld [vmem:[#allocation5 + $0x6e0] ss:$8 sps:$4 sm:$0xff]  }
 0x15d   :  { %v406_v8 = vpop.f32.mrb[4].mxu0  ;;  %v496_v9 = vpack.c.bf16 %v482_v6, %v480_v5  ;;  %v3510_v5 = vld [vmem:[#allocation5 + $0x660] ss:$8 sps:$4 sm:$0xff]   ;;  %v3511_v6 = vld [vmem:[#allocation5 + $0x6f0] ss:$8 sps:$4 sm:$0xff]  }
 0x15e   :  { %v467_v10 = vadd.f32 %v456_v56, %v406_v8  ;;  %v408_v11 = vpop.f32.mrb[5].mxu0  ;;  %v3513_v8 = vld [vmem:[#allocation5 + $0x700] ss:$8 sps:$4 sm:$0xff]  }
 0x15f   :  { %v468_v12 = vadd.f32 %v460_v57, %v408_v11  ;;  %v410_v13 = vpop.f32.mrb[6].mxu0  ;;  %531 = vmatprep.subr.bf16.mxu1 %v496_v9  ;;  %v3516_v11 = vld [vmem:[#allocation5 + $0x690] ss:$8 sps:$4 sm:$0xff]  }
 0x160   :  { %v469_v14 = vadd.f32 %v456_v56, %v410_v13  ;;  %v412_v15 = vpop.f32.mrb[7].mxu0  ;;  %532 = vmatpush1.bf16.msra.mxu1 %v495_v7  ;;  %v483_v17 = vmax.f32 %v467_v10, 0.0  ;;  %v3515_v10 = vld [vmem:[#allocation5 + $0x710] ss:$8 sps:$4 sm:$0xff]  }
 0x161   :  { %v470_v16 = vadd.f32 %v460_v57, %v412_v15  ;;  %v484_v19 = vmax.f32 %v468_v12, 0.0  ;;  %v3517_v12 = vld [vmem:[#allocation5 + $0x7a0] ss:$8 sps:$4 sm:$0xff]  }
 0x162   :  { %v485_v18 = vmax.f32 %v469_v14, 0.0 }
 0x163   :  { %v486_v20 = vmax.f32 %v470_v16, 0.0 }
 0x164   :  { %v497_v21 = vpack.c.bf16 %v485_v18, %v483_v17 }
 0x165   :  { %v498_v22 = vpack.c.bf16 %v486_v20, %v484_v19  ;;  %v416_v23 = vpop.f32.mrb[8].mxu0 }
 0x166   :  { %v471_v24 = vadd.f32 %v456_v56, %v416_v23  ;;  %v418_v25 = vpop.f32.mrb[9].mxu0 }
 0x167   :  { %v472_v26 = vadd.f32 %v460_v57, %v418_v25  ;;  %v420_v27 = vpop.f32.mrb[10].mxu0  ;;  %533 = vmatprep.subr.bf16.mxu1 %v498_v22 }
 0x168   :  { %v473_v28 = vadd.f32 %v456_v56, %v420_v27  ;;  %v422_v29 = vpop.f32.mrb[11].mxu0  ;;  %534 = vmatpush1.bf16.msra.mxu1 %v497_v21  ;;  %v487_v31 = vmax.f32 %v471_v24, 0.0 }
 0x169   :  { %v474_v30 = vadd.f32 %v460_v57, %v422_v29  ;;  %v488_v33 = vmax.f32 %v472_v26, 0.0 }
 0x16a   :  { %v489_v32 = vmax.f32 %v473_v28, 0.0 }
 0x16b   :  { %v490_v34 = vmax.f32 %v474_v30, 0.0 }
 0x16c   :  { %v499_v35 = vpack.c.bf16 %v489_v32, %v487_v31  ;;  %v3518_v31 = vld [vmem:[#allocation5 + $0x720] ss:$8 sps:$4 sm:$0xff]   ;;  %v3519_v32 = vld [vmem:[#allocation5 + $0x7b0] ss:$8 sps:$4 sm:$0xff]  }
 0x16d   :  { %v500_v36 = vpack.c.bf16 %v490_v34, %v488_v33  ;;  %v426_v37 = vpop.f32.mrb[12].mxu0 }
 0x16e   :  { %v475_v38 = vadd.f32 %v456_v56, %v426_v37  ;;  %v428_v39 = vpop.f32.mrb[13].mxu0 }
 0x16f   :  { %v476_v40 = vadd.f32 %v460_v57, %v428_v39  ;;  %v430_v41 = vpop.f32.mrb[14].mxu0  ;;  %535 = vmatprep.subr.bf16.mxu1 %v500_v36 }
 0x170   :  { %v477_v42 = vadd.f32 %v456_v56, %v430_v41  ;;  %v432_v43 = vpop.f32.mrb[15].mxu0  ;;  %536 = vmatpush1.bf16.msra.mxu1 %v499_v35  ;;  %v491_v45 = vmax.f32 %v475_v38, 0.0  ;;  %v3498_v56 = vld [vmem:[#allocation5 + $0x5f0] ss:$8 sps:$4 sm:$0x7f]  }
 0x171   :  { %v478_v44 = vadd.f32 %v460_v57, %v432_v43  ;;  %v492_v47 = vmax.f32 %v476_v40, 0.0  ;;  %v3501_v57 = vld [vmem:[#allocation5 + $0x6a0] ss:$8 sps:$4 sm:$0xff]   ;;  %v3520_v38 = vld [vmem:[#allocation5 + $0x730] ss:$8 sps:$4 sm:$0xff]  }
 0x172   :  { %v493_v46 = vmax.f32 %v477_v42, 0.0  ;;  %v3521_v41 = vld [vmem:[#allocation5 + $0x7c0] ss:$8 sps:$4 sm:$0xff]  }
 0x173   :  { %v494_v48 = vmax.f32 %v478_v44, 0.0 }
 0x174   :  { %v501_v49 = vpack.c.bf16 %v493_v46, %v491_v45  ;;  %v3522_v45 = vld [vmem:[#allocation5 + $0x740] ss:$8 sps:$4 sm:$0xff]   ;;  %v3523_v46 = vld [vmem:[#allocation5 + $0x7d0] ss:$8 sps:$4 sm:$0xff]  }
 0x175   :  { %v502_v50 = vpack.c.bf16 %v494_v48, %v492_v47  ;;  %v3524_v47 = vld [vmem:[#allocation5 + $0x750] ss:$8 sps:$4 sm:$0xff]   ;;  %v3525_v48 = vld [vmem:[#allocation5 + $0x7e0] ss:$8 sps:$4 sm:$0xff]  }
 0x176   :  { %v526_v51 = vsel %vm322_vm2, %v501_v49, 0  ;;  %v3526_v49 = vld [vmem:[#allocation5 + $0x760] ss:$8 sps:$4 sm:$0xff]  }
 0x177   :  { %2900 = vmatprep.subr.msk.bf16.mxu1 %vm322_vm2, %v502_v50 }
 0x178   :  { %538 = vmatpush1.bf16.msra.mxu1 %v526_v51 }
 0x179   :  { %604 = vmatprep.subr.bf16.mxu1 %v496_v9  ;;  %v3514_v9 = vld [vmem:[#allocation5 + $0x680] ss:$8 sps:$4 sm:$0xff]  }
 0x17b   :  { %2901 = vmatmul.mubr.msk.bf16.vlgmr.msra.gmra.mrb[0].mxu1 %vm517_vm3, %v3497_v54  ;;  %v3529_v54 = vld [vmem:[#allocation5 + $0x800] ss:$8 sps:$4 sm:$0xff]  }
 0x17c   :  { %605 = vmatpush1.bf16.msra.mxu1 %v495_v7  ;;  %573 = vmatprep.mubr.bf16.mxu1 %v3802_v0  ;;  %v3512_v7 = vld [vmem:[#allocation5 + $0x670] ss:$8 sps:$4 sm:$0xff]  }
 0x17d   :  { %606 = vmatprep.subr.bf16.mxu1 %v498_v22 }
 0x180   :  { %607 = vmatpush1.bf16.msra.mxu1 %v497_v21 }
 0x181   :  { %608 = vmatprep.subr.bf16.mxu1 %v500_v36 }
 0x183   :  { %2902 = vmatmul.mubr.msk.bf16.gmra.mrb[4].mxu1 %vm517_vm3, %v3498_v56  ;;  %v3530_v56 = vld [vmem:[#allocation5 + $0x780] ss:$8 sps:$4 sm:$0xff]  }
 0x184   :  { %609 = vmatpush1.bf16.msra.mxu1 %v499_v35  ;;  %636 = vmatprep.mubr.bf16.mxu1 %v3802_v0 }
 0x185   :  { %2905 = vmatprep.subr.msk.bf16.mxu1 %vm322_vm2, %v502_v50  ;;  %v3527_v50 = vld [vmem:[#allocation5 + $0x7f0] ss:$8 sps:$4 sm:$0xff]  }
 0x188   :  { %611 = vmatpush1.bf16.msra.mxu1 %v526_v51  ;;  %v3528_v51 = vld [vmem:[#allocation5 + $0x770] ss:$8 sps:$4 sm:$0xff]  }
 0x189   :  { %3090 = vmatprep.subr.bf16.mxu1 %v3501_v57  ;;  %v3531_v57 = vld [vmem:[#allocation5 + $0x810] ss:$8 sps:$4 sm:$0xff]  }
 0x18b   :  { %2906 = vmatmul.mubr.msk.bf16.vlgmr.msra.gmra.mrb[8].mxu1 %vm517_vm3, %v3499_v58  ;;  %v3532_v58 = vld [vmem:[#allocation5 + $0x790] ss:$8 sps:$4 sm:$0xff]  }
 0x18c   :  { %646 = vmatprep.mubr.bf16.mxu1 %v3802_v0  ;;  %3091 = vmatpush3.bf16.msra.mxu1 %v3502_v59  ;;  %v3533_v59 = vld [vmem:[#allocation5 + $0xe0] ss:$8 sps:$4 sm:$0xff]  }
 0x18d   :  { %3092 = vmatprep.subr.bf16.mxu1 %v3503_v60  ;;  %v3535_v60 = vld [vmem:[#allocation5 + $0xe4] ss:$8 sps:$4 sm:$0xff]  }
 0x18e   :  { %1158 = vmatprep.subr.bf16.mxu0 %v3535_v60 }
 0x18f   :  { %1159 = vmatpush1.bf16.msra.mxu0 %v3533_v59  ;;  %v3565_v59 = vld [vmem:[#allocation5 + $0x84] ss:$8 sps:$4 sm:$0xff]  }
 0x190   :  { %3093 = vmatpush3.bf16.msra.mxu1 %v3504_v61  ;;  %v3538_v61 = vld [vmem:[#allocation5 + $0xf4] ss:$8 sps:$4 sm:$0xff]  }
 0x191   :  { %3094 = vmatprep.subr.bf16.mxu1 %v3505_v63  ;;  %1160 = vmatprep.subr.bf16.mxu0 %v3538_v61  ;;  %v3541_v63 = vld [vmem:[#allocation5 + $0x104] ss:$8 sps:$4 sm:$0xff]   ;;  %v3563_v61 = vld [vmem:[#allocation5 + $0x80] ss:$8 sps:$4 sm:$0xff]  }
 0x193   :  { %2907 = vmatmul.mubr.msk.bf16.gmra.mrb[12].mxu1 %vm517_vm3, %v3500_v62  ;;  %v3536_v62 = vld [vmem:[#allocation5 + $0xf0] ss:$8 sps:$4 sm:$0xff]  }
 0x194   :  { %3095 = vmatpush3.bf16.msra.mxu1 %v3506_v1  ;;  %1161 = vmatpush1.bf16.msra.mxu0 %v3536_v62  ;;  %v3539_v1 = vld [vmem:[#allocation5 + $0x100] ss:$8 sps:$4 sm:$0xff]  }
 0x195   :  { %3096 = vmatprep.subr.bf16.mxu1 %v3507_v2  ;;  %1162 = vmatprep.subr.bf16.mxu0 %v3541_v63  ;;  %v3544_v2 = vld [vmem:[#allocation5 + $0x114] ss:$8 sps:$4 sm:$0xff]  }
 0x196   :  { %v3568_v63 = vld [vmem:[#allocation5 + $0x94] ss:$8 sps:$4 sm:$0xff]  }
 0x198   :  { %3097 = vmatpush3.bf16.msra.mxu1 %v3508_v3  ;;  %1163 = vmatpush1.bf16.msra.mxu0 %v3539_v1  ;;  %v3542_v3 = vld [vmem:[#allocation5 + $0x110] ss:$8 sps:$4 sm:$0xff]  }
 0x199   :  { %3098 = vmatprep.subr.bf16.mxu1 %v3509_v4  ;;  %1164 = vmatprep.subr.bf16.mxu0 %v3544_v2  ;;  %v3547_v4 = vld [vmem:[#allocation5 + $0x124] ss:$8 sps:$4 sm:$0xff]   ;;  %v3566_v1 = vld [vmem:[#allocation5 + $0x90] ss:$8 sps:$4 sm:$0xff]  }
 0x19a   :  { %v3571_v2 = vld [vmem:[#allocation5 + $0xa4] ss:$8 sps:$4 sm:$0xff]  }
 0x19c   :  { %3099 = vmatpush3.bf16.msra.mxu1 %v3510_v5  ;;  %1165 = vmatpush1.bf16.msra.mxu0 %v3542_v3  ;;  %v3545_v5 = vld [vmem:[#allocation5 + $0x120] ss:$8 sps:$4 sm:$0xff]  }
 0x19d   :  { %3100 = vmatprep.subr.bf16.mxu1 %v3511_v6  ;;  %1166 = vmatprep.subr.bf16.mxu0 %v3547_v4  ;;  %v3550_v6 = vld [vmem:[#allocation5 + $0x134] ss:$8 sps:$4 sm:$0xff]   ;;  %v3569_v3 = vld [vmem:[#allocation5 + $0xa0] ss:$8 sps:$4 sm:$0xff]  }
 0x19e   :  { %v3574_v4 = vld [vmem:[#allocation5 + $0xb4] ss:$8 sps:$4 sm:$0xff]  }
 0x1a0   :  { %3101 = vmatpush3.bf16.msra.mxu1 %v3512_v7  ;;  %1167 = vmatpush1.bf16.msra.mxu0 %v3545_v5  ;;  %v3548_v7 = vld [vmem:[#allocation5 + $0x130] ss:$8 sps:$4 sm:$0xff]  }
 0x1a1   :  { %3102 = vmatprep.subr.bf16.mxu1 %v3513_v8  ;;  %1168 = vmatprep.subr.bf16.mxu0 %v3550_v6  ;;  %v3553_v8 = vld [vmem:[#allocation5 + $0x144] ss:$8 sps:$4 sm:$0xff]   ;;  %v3572_v5 = vld [vmem:[#allocation5 + $0xb0] ss:$8 sps:$4 sm:$0xff]  }
 0x1a2   :  { %v3577_v6 = vld [vmem:[#allocation5 + $0xc4] ss:$8 sps:$4 sm:$0xff]  }
 0x1a4   :  { %3103 = vmatpush3.bf16.msra.mxu1 %v3514_v9  ;;  %1169 = vmatpush1.bf16.msra.mxu0 %v3548_v7  ;;  %v3551_v9 = vld [vmem:[#allocation5 + $0x140] ss:$8 sps:$4 sm:$0xff]  }
 0x1a5   :  { %3104 = vmatprep.subr.bf16.mxu1 %v3515_v10  ;;  %1170 = vmatprep.subr.bf16.mxu0 %v3553_v8  ;;  %v3554_v10 = vld [vmem:[#allocation5 + $0x150] ss:$8 sps:$4 sm:$0xff]   ;;  %v3575_v7 = vld [vmem:[#allocation5 + $0xc0] ss:$8 sps:$4 sm:$0xff]   ;;  %v3580_v8 = vld [vmem:[#allocation5 + $0xd4] ss:$8 sps:$4 sm:$0xff]  }
 0x1a8   :  { %3105 = vmatpush3.bf16.msra.mxu1 %v3516_v11  ;;  %1171 = vmatpush1.bf16.msra.mxu0 %v3551_v9  ;;  %v3556_v11 = vld [vmem:[#allocation5 + $0x154] ss:$8 sps:$4 sm:$0xff]   ;;  %v3578_v9 = vld [vmem:[#allocation5 + $0xd0] ss:$8 sps:$4 sm:$0xff]  }
 0x1a9   :  { %3118 = vmatprep.subr.bf16.mxu1 %v3517_v12  ;;  %v3559_v12 = vld [vmem:[#allocation5 + $0x64] ss:$8 sps:$4 sm:$0xff]   ;;  %1172 = vmatprep.subr.bf16.mxu0 %v3556_v11  ;;  %v3581_v11 = vld [vmem:[#allocation5 + $0x160] ss:$8 sps:$4 sm:$0xff]  }
 0x1ac   :  { %1173 = vmatpush1.bf16.msra.mxu0 %v3554_v10  ;;  %v3583_v10 = vld [vmem:[#allocation5 + $0x164] ss:$8 sps:$4 sm:$0xff]  }
 0x1ad   :  { %1291 = vmatprep.subr.bf16.mxu0 %v3559_v12  ;;  %v3586_v12 = vld [vmem:[#allocation5 + $0x174] ss:$8 sps:$4 sm:$0xff]  }
 0x24e   :  { %v565_v13 = vpop.f32.mrb[0].mxu1 }
 0x24f   :  { %v567_v14 = vpop.f32.mrb[1].mxu1 }
 0x250   :  { %v569_v15 = vpop.f32.mrb[2].mxu1 }
 0x251   :  { %v571_v16 = vpop.f32.mrb[3].mxu1 }
 0x256   :  { %v575_v17 = vpop.f32.mrb[4].mxu1 }
 0x257   :  { %v577_v18 = vpop.f32.mrb[5].mxu1 }
 0x258   :  { %v579_v19 = vpop.f32.mrb[6].mxu1 }
 0x259   :  { %v581_v20 = vpop.f32.mrb[7].mxu1 }
 0x25e   :  { %v638_v21 = vpop.f32.mrb[8].mxu1 }
 0x25f   :  { %v657_v22 = vmax.f32 %v565_v13, %v638_v21  ;;  %v640_v23 = vpop.f32.mrb[9].mxu1 }
 0x260   :  { %v658_v24 = vmax.f32 %v567_v14, %v640_v23  ;;  %v642_v25 = vpop.f32.mrb[10].mxu1 }
 0x261   :  { %v659_v26 = vmax.f32 %v569_v15, %v642_v25  ;;  %v644_v27 = vpop.f32.mrb[11].mxu1 }
 0x262   :  { %v660_v28 = vmax.f32 %v571_v16, %v644_v27 }
 0x263   :  { %v665_v29 = vpack.c.bf16 %v659_v26, %v657_v22 }
 0x264   :  { %v666_v30 = vpack.c.bf16 %v660_v28, %v658_v24 }
 0x266   :  { %v648_v33 = vpop.f32.mrb[12].mxu1  ;;  %829 = vmatprep.mubr.bf16.mxu1 %v666_v30 }
 0x267   :  { %v661_v34 = vmax.f32 %v575_v17, %v648_v33  ;;  %v650_v35 = vpop.f32.mrb[13].mxu1  ;;  %830 = vmatmul.mubr.bf16.vlgmr.msra.gmra.mrb[16].mxu1 %v665_v29 }
 0x268   :  { %v662_v36 = vmax.f32 %v577_v18, %v650_v35  ;;  %3119 = vmatpush3.bf16.msra.mxu1 %v3518_v31  ;;  %v652_v37 = vpop.f32.mrb[14].mxu1 }
 0x269   :  { %v663_v39 = vmax.f32 %v579_v19, %v652_v37  ;;  %v654_v40 = vpop.f32.mrb[15].mxu1  ;;  %3120 = vmatprep.subr.bf16.mxu1 %v3519_v32 }
 0x26a   :  { %v664_v42 = vmax.f32 %v581_v20, %v654_v40 }
 0x26b   :  { %v667_v43 = vpack.c.bf16 %v663_v39, %v661_v34 }
 0x26c   :  { %v668_v44 = vpack.c.bf16 %v664_v42, %v662_v36  ;;  %3121 = vmatpush3.bf16.msra.mxu1 %v3520_v38 }
 0x26d   :  { %3122 = vmatprep.subr.bf16.mxu1 %v3521_v41 }
 0x26e   :  { %837 = vmatprep.mubr.bf16.mxu1 %v668_v44 }
 0x26f   :  { %838 = vmatmul.mubr.bf16.gmra.mrb[20].mxu1 %v667_v43 }
 0x270   :  { %3123 = vmatpush3.bf16.msra.mxu1 %v3522_v45  ;;  %1006 = vmatprep.mubr.bf16.mxu1 %v666_v30 }
 0x271   :  { %3124 = vmatprep.subr.bf16.mxu1 %v3523_v46 }
 0x274   :  { %3125 = vmatpush3.bf16.msra.mxu1 %v3524_v47 }
 0x275   :  { %3126 = vmatprep.subr.bf16.mxu1 %v3525_v48 }
 0x278   :  { %3127 = vmatpush3.bf16.msra.mxu1 %v3526_v49  ;;  %v3557_v49 = vld [vmem:[#allocation5 + $0x60] ss:$8 sps:$4 sm:$0xff]  }
 0x279   :  { %3128 = vmatprep.subr.bf16.mxu1 %v3527_v50 }
 0x27c   :  { %3129 = vmatpush3.bf16.msra.mxu1 %v3528_v51 }
 0x27d   :  { %3130 = vmatprep.subr.bf16.mxu1 %v3529_v54 }
 0x280   :  { %3131 = vmatpush3.bf16.msra.mxu1 %v3530_v56  ;;  %v3562_v56 = vld [vmem:[#allocation5 + $0x74] ss:$8 sps:$4 sm:$0xff]  }
 0x281   :  { %3132 = vmatprep.subr.bf16.mxu1 %v3531_v57 }
 0x284   :  { %3133 = vmatpush3.bf16.msra.mxu1 %v3532_v58  ;;  %v3560_v58 = vld [vmem:[#allocation5 + $0x70] ss:$8 sps:$4 sm:$0xff]  }
 0x287   :  { %1007 = vmatmul.mubr.bf16.vlgmr.msra.gmra.mrb[24].mxu1 %v665_v29 }
 0x288   :  { %1014 = vmatprep.mubr.bf16.mxu1 %v668_v44 }
 0x28f   :  { %1015 = vmatmul.mubr.bf16.gmra.mrb[28].mxu1 %v667_v43 }
 0x290   :  { %1591 = vmatprep.mubr.bf16.mxu1 %v3802_v0 }
 0x33a   :  { %v3106_v13 = vpop.f32.mrb[16].mxu1 }
 0x33b   :  { %v3107_v14 = vpop.f32.mrb[17].mxu1 }
 0x33c   :  { %v3108_v15 = vadd.f32 %v3107_v14, %v3106_v13  ;;  %v3109_v16 = vpop.f32.mrb[18].mxu1  ;;  %v3584_v13 = vld [vmem:[#allocation5 + $0x170] ss:$8 sps:$4 sm:$0xff]   ;;  %v3589_v14 = vld [vmem:[#allocation5 + $0x184] ss:$8 sps:$4 sm:$0xff]  }
 0x33d   :  { %v3110_v17 = vpop.f32.mrb[19].mxu1 }
 0x33e   :  { %v3111_v18 = vadd.f32 %v3110_v17, %v3109_v16  ;;  %v3592_v16 = vld [vmem:[#allocation5 + $0x194] ss:$8 sps:$4 sm:$0xff]   ;;  %v3590_v17 = vld [vmem:[#allocation5 + $0x190] ss:$8 sps:$4 sm:$0xff]  }
 0x342   :  { %v3112_v19 = vpop.f32.mrb[20].mxu1 }
 0x343   :  { %v3113_v20 = vpop.f32.mrb[21].mxu1 }
 0x344   :  { %v3114_v21 = vadd.f32 %v3113_v20, %v3112_v19  ;;  %v3115_v22 = vpop.f32.mrb[22].mxu1  ;;  %v3593_v19 = vld [vmem:[#allocation5 + $0x1a0] ss:$8 sps:$4 sm:$0xff]   ;;  %v3598_v20 = vld [vmem:[#allocation5 + $0x1b4] ss:$8 sps:$4 sm:$0xff]  }
 0x345   :  { %v3116_v23 = vpop.f32.mrb[23].mxu1 }
 0x346   :  { %v3117_v24 = vadd.f32 %v3116_v23, %v3115_v22  ;;  %v3601_v22 = vld [vmem:[#allocation5 + $0x1c4] ss:$8 sps:$4 sm:$0xff]   ;;  %v3599_v23 = vld [vmem:[#allocation5 + $0x1c0] ss:$8 sps:$4 sm:$0xff]  }
 0x35a   :  { %v3134_v25 = vpop.f32.mrb[24].mxu1 }
 0x35b   :  { %v3135_v26 = vpop.f32.mrb[25].mxu1 }
 0x35c   :  { %v3136_v27 = vadd.f32 %v3135_v26, %v3134_v25  ;;  %v3137_v28 = vpop.f32.mrb[26].mxu1  ;;  %v3602_v25 = vld [vmem:[#allocation5 + $0x1d0] ss:$8 sps:$4 sm:$0xff]   ;;  %v1509_v26 = vld [vmem:[#allocation7 + $0x1] ss:$8 sm:$0x3] }
 0x35d   :  { %v3138_v29 = vpop.f32.mrb[27].mxu1 }
 0x35e   :  { %v1023_v30 = vmax.f32 %v3108_v15, %v3136_v27  ;;  %v3139_v31 = vadd.f32 %v3138_v29, %v3137_v28  ;;  %v3587_v15 = vld [vmem:[#allocation5 + $0x180] ss:$8 sps:$4 sm:$0xff]   ;;  %v1514_v27 = vrot.slane %v1509_v26, %v455_v53  ;;  %v1518_v28 = vrot.slane %v1509_v26, %v459_v55 }
 0x360   :  { %v1024_v32 = vmax.f32 %v3111_v18, %v3139_v31  ;;  %v3595_v18 = vld [vmem:[#allocation5 + $0x1a4] ss:$8 sps:$4 sm:$0xff]  }
 0x362   :  { %v1027_v33 = vpack.c.bf16 %v1024_v32, %v1023_v30  ;;  %v3140_v34 = vpop.f32.mrb[28].mxu1 }
 0x363   :  { %v3141_v35 = vpop.f32.mrb[29].mxu1 }
 0x364   :  { %v3142_v36 = vadd.f32 %v3141_v35, %v3140_v34  ;;  %v3143_v37 = vpop.f32.mrb[30].mxu1  ;;  %v1064_v39 = vshll.u32 %v1027_v33, 16  ;;  %v1062_v45 = vshrl.u32 %v1027_v33, 16  ;;  %v1362_v47 = vrot.slane %v1027_v33, 1 }
 0x365   :  { %v3144_v38 = vpop.f32.mrb[31].mxu1 }
 0x366   :  { %v1025_v40 = vmax.f32 %v3114_v21, %v3142_v36  ;;  %v3145_v41 = vadd.f32 %v3144_v38, %v3143_v37  ;;  %v1066_v44 = vrot.slane %v1064_v39, 1  ;;  %v3596_v21 = vld [vmem:[#allocation5 + $0x1b0] ss:$8 sps:$4 sm:$0xff]  }
 0x368   :  { %v1026_v42 = vmax.f32 %v3117_v24, %v3145_v41  ;;  %v1067_v50 = vor.u32 %v1066_v44, %v1062_v45  ;;  %v3604_v24 = vld [vmem:[#allocation5 + $0x1d4] ss:$8 sps:$4 sm:$0xff]  }
 0x36a   :  { %v3932_v43 = vpack.c.bf16 %v1026_v42, %v1025_v40 }
 0x36c   :  { %v1069_v46 = vshll.u32 %v3932_v43, 16  ;;  %v1363_v48 = vrot.slane %v3932_v43, 1  ;;  %v1073_v60 = vshrl.u32 %v3932_v43, 16 }
 0x36e   :  { %v1071_v51 = vrot.slane %v1069_v46, 1  ;;  %v3939_v54 = vsel %vm322_vm2, %v1362_v47, %v1363_v48 }
 0x370   :  { %v1072_v57 = vsel %vm75_vm0, %v1067_v50, %v1071_v51  ;;  %v1075_v62 = vor.u32 %v1073_v60, %v1071_v51  ;;  %v3606_v60 = vld [vmem:[#allocation5 + $0x830] ss:$8 sps:$4 sm:$0x3f]  }
 0x371   :  { %1191 = vmatmul.mubr.bf16.vlgmr.msra.gmra.mrb[16].mxu0 %v1072_v57 }
 0x372   :  { %1292 = vmatpush1.bf16.msra.mxu0 %v3557_v49  ;;  %1200 = vmatprep.mubr.bf16.mxu0 %v3802_v0 }
 0x373   :  { %1293 = vmatprep.subr.bf16.mxu0 %v3562_v56 }
 0x376   :  { %1294 = vmatpush1.bf16.msra.mxu0 %v3560_v58  ;;  %v3605_v58 = vld [vmem:[#allocation5 + $0x820] ss:$8 sps:$4 sm:$0x3f]  }
 0x377   :  { %1295 = vmatprep.subr.bf16.mxu0 %v3565_v59  ;;  %v3607_v59 = vld [vmem:[#allocation5 + $0x8c0] ss:$8 sps:$4 sm:$0xff]  }
 0x379   :  { %1201 = vmatmul.mubr.bf16.gmra.mrb[20].mxu0 %v1075_v62  ;;  %v3609_v62 = vld [vmem:[#allocation5 + $0x8d0] ss:$8 sps:$4 sm:$0xff]  }
 0x37a   :  { %1296 = vmatpush1.bf16.msra.mxu0 %v3563_v61  ;;  %1323 = vmatprep.mubr.bf16.mxu0 %v3802_v0  ;;  %v3608_v61 = vld [vmem:[#allocation5 + $0x840] ss:$8 sps:$4 sm:$0xff]  }
 0x37b   :  { %1297 = vmatprep.subr.bf16.mxu0 %v3568_v63  ;;  %v3610_v63 = vld [vmem:[#allocation5 + $0x850] ss:$8 sps:$4 sm:$0xff]  }
 0x37e   :  { %1298 = vmatpush1.bf16.msra.mxu0 %v3566_v1  ;;  %v3611_v1 = vld [vmem:[#allocation5 + $0x8e0] ss:$8 sps:$4 sm:$0xff]  }
 0x37f   :  { %1299 = vmatprep.subr.bf16.mxu0 %v3571_v2  ;;  %v3612_v2 = vld [vmem:[#allocation5 + $0x860] ss:$8 sps:$4 sm:$0xff]  }
 0x382   :  { %1300 = vmatpush1.bf16.msra.mxu0 %v3569_v3  ;;  %v3613_v3 = vld [vmem:[#allocation5 + $0x8f0] ss:$8 sps:$4 sm:$0xff]  }
 0x383   :  { %1301 = vmatprep.subr.bf16.mxu0 %v3574_v4  ;;  %v3614_v4 = vld [vmem:[#allocation5 + $0x870] ss:$8 sps:$4 sm:$0xff]  }
 0x386   :  { %1302 = vmatpush1.bf16.msra.mxu0 %v3572_v5  ;;  %v3616_v5 = vld [vmem:[#allocation5 + $0x880] ss:$8 sps:$4 sm:$0xff]  }
 0x387   :  { %1303 = vmatprep.subr.bf16.mxu0 %v3577_v6  ;;  %v3617_v6 = vld [vmem:[#allocation5 + $0x910] ss:$8 sps:$4 sm:$0xff]  }
 0x38a   :  { %1304 = vmatpush1.bf16.msra.mxu0 %v3575_v7  ;;  %v3618_v7 = vld [vmem:[#allocation5 + $0x890] ss:$8 sps:$4 sm:$0xff]  }
 0x38b   :  { %1305 = vmatprep.subr.bf16.mxu0 %v3580_v8  ;;  %v3619_v8 = vld [vmem:[#allocation5 + $0x920] ss:$8 sps:$4 sm:$0xff]  }
 0x38e   :  { %1306 = vmatpush1.bf16.msra.mxu0 %v3578_v9  ;;  %v3620_v9 = vld [vmem:[#allocation5 + $0x8a0] ss:$8 sps:$4 sm:$0xff]  }
 0x38f   :  { %1447 = vmatprep.subr.bf16.mxu0 %v3583_v10  ;;  %v3621_v10 = vld [vmem:[#allocation5 + $0x930] ss:$8 sps:$4 sm:$0xff]  }
 0x391   :  { %1324 = vmatmul.mubr.bf16.vlgmr.msra.gmra.mrb[16].mxu0 %v1027_v33 }
 0x392   :  { %1448 = vmatpush1.bf16.msra.mxu0 %v3581_v11  ;;  %1333 = vmatprep.mubr.bf16.mxu0 %v3802_v0  ;;  %v3622_v11 = vld [vmem:[#allocation5 + $0x8b0] ss:$8 sps:$4 sm:$0xff]  }
 0x393   :  { %1449 = vmatprep.subr.bf16.mxu0 %v3586_v12  ;;  %v3623_v12 = vld [vmem:[#allocation5 + $0x9c0] ss:$8 sps:$4 sm:$0xff]  }
 0x396   :  { %1450 = vmatpush1.bf16.msra.mxu0 %v3584_v13 }
 0x397   :  { %1451 = vmatprep.subr.bf16.mxu0 %v3589_v14 }
 0x399   :  { %1334 = vmatmul.mubr.bf16.gmra.mrb[20].mxu0 %v3932_v43 }
 0x39a   :  { %1452 = vmatpush1.bf16.msra.mxu0 %v3587_v15  ;;  %1479 = vmatprep.mubr.bf16.mxu0 %v3802_v0 }
 0x39b   :  { %1453 = vmatprep.subr.bf16.mxu0 %v3592_v16 }
 0x39e   :  { %1454 = vmatpush1.bf16.msra.mxu0 %v3590_v17 }
 0x39f   :  { %1455 = vmatprep.subr.bf16.mxu0 %v3595_v18 }
 0x3a2   :  { %1456 = vmatpush1.bf16.msra.mxu0 %v3593_v19 }
 0x3a3   :  { %1457 = vmatprep.subr.bf16.mxu0 %v3598_v20 }
 0x3a6   :  { %1458 = vmatpush1.bf16.msra.mxu0 %v3596_v21 }
 0x3a7   :  { %1459 = vmatprep.subr.bf16.mxu0 %v3601_v22 }
 0x3aa   :  { %1460 = vmatpush1.bf16.msra.mxu0 %v3599_v23 }
 0x3ab   :  { %1461 = vmatprep.subr.bf16.mxu0 %v3604_v24 }
 0x3ae   :  { %1462 = vmatpush1.bf16.msra.mxu0 %v3602_v25 }
 0x3b1   :  { %1480 = vmatmul.mubr.bf16.vlgmr.msra.gmra.mrb[16].mxu0 %v3939_v54 }
 0x3b2   :  { %1489 = vmatprep.mubr.bf16.mxu0 %v3802_v0 }
 0x3b9   :  { %1490 = vmatmul.mubr.bf16.gmra.mrb[20].mxu0 %v1363_v48 }
 0x484   :  { %v1481_v29 = vpop.f32.mrb[16].mxu0 }
 0x485   :  { %v1521_v30 = vadd.f32 %v1514_v27, %v1481_v29  ;;  %v1483_v31 = vpop.f32.mrb[17].mxu0  ;;  %v3626_v29 = vld [vmem:[#allocation5 + $0x950] ss:$8 sps:$4 sm:$0xff]  }
 0x486   :  { %v1522_v32 = vadd.f32 %v1518_v28, %v1483_v31  ;;  %v1485_v33 = vpop.f32.mrb[18].mxu0  ;;  %v3628_v31 = vld [vmem:[#allocation5 + $0x960] ss:$8 sps:$4 sm:$0xff]  }
 0x487   :  { %v1523_v34 = vadd.f32 %v1514_v27, %v1485_v33  ;;  %v1487_v35 = vpop.f32.mrb[19].mxu0  ;;  %v1529_v37 = vmax.f32 %v1521_v30, 0.0  ;;  %v3627_v30 = vld [vmem:[#allocation5 + $0x9e0] ss:$8 sps:$4 sm:$0xff]   ;;  %v3630_v33 = vld [vmem:[#allocation5 + $0x970] ss:$8 sps:$4 sm:$0xff]  }
 0x488   :  { %v1524_v36 = vadd.f32 %v1518_v28, %v1487_v35  ;;  %v1530_v39 = vmax.f32 %v1522_v32, 0.0  ;;  %v3629_v32 = vld [vmem:[#allocation5 + $0x9f0] ss:$8 sps:$4 sm:$0xff]   ;;  %v3632_v35 = vld [vmem:[#allocation5 + $0x980] ss:$8 sps:$4 sm:$0xff]  }
 0x489   :  { %v1531_v38 = vmax.f32 %v1523_v34, 0.0  ;;  %v3631_v34 = vld [vmem:[#allocation5 + $0xa00] ss:$8 sps:$4 sm:$0xff]  }
 0x48a   :  { %v1532_v40 = vmax.f32 %v1524_v36, 0.0  ;;  %v3633_v36 = vld [vmem:[#allocation5 + $0xa10] ss:$8 sps:$4 sm:$0xff]  }
 0x48b   :  { %v1537_v41 = vpack.c.bf16 %v1531_v38, %v1529_v37  ;;  %v3634_v37 = vld [vmem:[#allocation5 + $0x990] ss:$8 sps:$4 sm:$0xff]   ;;  %v3635_v38 = vld [vmem:[#allocation5 + $0xa20] ss:$8 sps:$4 sm:$0xff]  }
 0x48c   :  { %v1538_v42 = vpack.c.bf16 %v1532_v40, %v1530_v39  ;;  %v1491_v43 = vpop.f32.mrb[20].mxu0  ;;  %v3636_v39 = vld [vmem:[#allocation5 + $0x9a0] ss:$8 sps:$4 sm:$0xff]   ;;  %v3637_v40 = vld [vmem:[#allocation5 + $0xa30] ss:$8 sps:$4 sm:$0xff]  }
 0x48d   :  { %v1525_v44 = vadd.f32 %v1514_v27, %v1491_v43  ;;  %v1493_v53 = vpop.f32.mrb[21].mxu0  ;;  %v3640_v43 = vld [vmem:[#allocation5 + $0x260] ss:$8 sps:$4 sm:$0xff]  }
 0x48e   :  { %v1526_v45 = vadd.f32 %v1518_v28, %v1493_v53  ;;  %v1495_v52 = vpop.f32.mrb[22].mxu0  ;;  %1559 = vmatprep.subr.bf16.mxu1 %v1538_v42  ;;  %v3641_v53 = vld [vmem:[#allocation5 + $0x1f0] ss:$8 sps:$4 sm:$0xff]  }
 0x48f   :  { %v1527_v55 = vadd.f32 %v1514_v27, %v1495_v52  ;;  %v1497_v46 = vpop.f32.mrb[23].mxu0  ;;  %1560 = vmatpush1.bf16.msra.mxu1 %v1537_v41  ;;  %v1533_v48 = vmax.f32 %v1525_v44, 0.0  ;;  %v3624_v27 = vld [vmem:[#allocation5 + $0x940] ss:$8 sps:$4 sm:$0xff]   ;;  %v3803_v44 = vmov 0.0  }
 0x490   :  { %v1528_v47 = vadd.f32 %v1518_v28, %v1497_v46  ;;  %v1534_v50 = vmax.f32 %v1526_v45, 0.0  ;;  %v3625_v28 = vld [vmem:[#allocation5 + $0x9d0] ss:$8 sps:$4 sm:$0xff]   ;;  %3262 = vmatprep.subr.bf16.mxu0 %v3803_v44  ;;  %v3643_v52 = vld [vmem:[#allocation5 + $0x200] ss:$8 sps:$4 sm:$0xff]   ;;  %3278 = vmatprep.mubr.msk.bf16.mxu0 %vm3804_vm6, %v3803_v44 }
 0x491   :  { %v1535_v49 = vmax.f32 %v1527_v55, 0.0  ;;  %3263 = vmatpush3.bf16.msra.mxu0 %v3640_v43  ;;  %v3642_v45 = vld [vmem:[#allocation5 + $0x270] ss:$8 sps:$4 sm:$0xff]   ;;  %v3644_v55 = vld [vmem:[#allocation5 + $0x280] ss:$8 sps:$4 sm:$0xff]  }
 0x492   :  { %v1536_v51 = vmax.f32 %v1528_v47, 0.0  ;;  %3264 = vmatprep.subr.bf16.mxu0 %v3803_v44  ;;  %v3645_v46 = vld [vmem:[#allocation5 + $0x210] ss:$8 sps:$4 sm:$0xff]  }
 0x493   :  { %v1539_v54 = vpack.c.bf16 %v1535_v49, %v1533_v48  ;;  %v3646_v47 = vld [vmem:[#allocation5 + $0x290] ss:$8 sps:$4 sm:$0xff]   ;;  %v3647_v48 = vld [vmem:[#allocation5 + $0x220] ss:$8 sps:$4 sm:$0xff]  }
 0x494   :  { %v1540_v56 = vpack.c.bf16 %v1536_v51, %v1534_v50  ;;  %v3648_v49 = vld [vmem:[#allocation5 + $0x2a0] ss:$8 sps:$4 sm:$0xff]   ;;  %v3649_v50 = vld [vmem:[#allocation5 + $0x230] ss:$8 sps:$4 sm:$0xff]  }
 0x495   :  { %v1554_v57 = vsel %vm1552_vm4, %v1539_v54, 0  ;;  %3265 = vmatpush3.bf16.msra.mxu0 %v3642_v45  ;;  %v3650_v51 = vld [vmem:[#allocation5 + $0x2b0] ss:$8 sps:$4 sm:$0xff]   ;;  %v3651_v54 = vld [vmem:[#allocation5 + $0x240] ss:$8 sps:$4 sm:$0xff]  }
 0x496   :  { %2989 = vmatprep.subr.msk.bf16.mxu1 %vm1552_vm4, %v1540_v56  ;;  %3266 = vmatprep.subr.bf16.mxu0 %v3803_v44  ;;  %v3685_v43 = vld [vmem:[#allocation5 + $0x4d0] ss:$8 sps:$4 sm:$0xff]  }
 0x497   :  { %1562 = vmatpush1.bf16.msra.mxu1 %v1554_v57 }
 0x498   :  { %1612 = vmatprep.subr.bf16.mxu1 %v1538_v42  ;;  %v3639_v42 = vld [vmem:[#allocation5 + $0x1e0] ss:$8 sps:$4 sm:$0xff]  }
 0x499   :  { %3267 = vmatpush3.bf16.msra.mxu0 %v3644_v55  ;;  %v3687_v55 = vld [vmem:[#allocation5 + $0x4e0] ss:$8 sps:$4 sm:$0xff]  }
 0x49a   :  { %2990 = vmatmul.mubr.msk.bf16.vlgmr.msra.gmra.mrb[32].mxu1 %vm1548_vm5, %v3605_v58  ;;  %3268 = vmatprep.subr.bf16.mxu0 %v3803_v44  ;;  %v3654_v58 = vld [vmem:[#allocation5 + $0x2d0] ss:$8 sps:$4 sm:$0xff]  }
 0x49b   :  { %1613 = vmatpush1.bf16.msra.mxu1 %v1537_v41  ;;  %1644 = vmatprep.mubr.bf16.mxu1 %v3802_v0  ;;  %v3615_v0 = vld [vmem:[#allocation5 + $0x900] ss:$8 sps:$4 sm:$0xff]   ;;  %v3638_v41 = vld [vmem:[#allocation5 + $0x9b0] ss:$8 sps:$4 sm:$0xff]  }
 0x49c   :  { %2992 = vmatprep.subr.msk.bf16.mxu1 %vm1552_vm4, %v1540_v56  ;;  %v3652_v56 = vld [vmem:[#allocation5 + $0x2c0] ss:$8 sps:$4 sm:$0xff]  }
 0x49d   :  { %3269 = vmatpush3.bf16.msra.mxu0 %v3646_v47  ;;  %v3689_v47 = vld [vmem:[#allocation5 + $0x500] ss:$8 sps:$4 sm:$0xff]  }
 0x49e   :  { %3270 = vmatprep.subr.bf16.mxu0 %v3803_v44 }
 0x49f   :  { %1615 = vmatpush1.bf16.msra.mxu1 %v1554_v57  ;;  %v3653_v57 = vld [vmem:[#allocation5 + $0x250] ss:$8 sps:$4 sm:$0xff]  }
 0x4a0   :  { %3146 = vmatprep.subr.bf16.mxu1 %v3607_v59 }
 0x4a1   :  { %3271 = vmatpush3.bf16.msra.mxu0 %v3648_v49  ;;  %v3691_v49 = vld [vmem:[#allocation5 + $0x520] ss:$8 sps:$4 sm:$0xff]  }
 0x4a2   :  { %2993 = vmatmul.mubr.msk.bf16.vlgmr.msra.gmra.mrb[36].mxu1 %vm1548_vm5, %v3606_v60  ;;  %3272 = vmatprep.subr.bf16.mxu0 %v3803_v44 }
 0x4a3   :  { %3147 = vmatpush3.bf16.msra.mxu1 %v3608_v61 }
 0x4a4   :  { %3148 = vmatprep.subr.bf16.mxu1 %v3609_v62 }
 0x4a5   :  { %3273 = vmatpush3.bf16.msra.mxu0 %v3650_v51  ;;  %v3693_v51 = vld [vmem:[#allocation5 + $0x540] ss:$8 sps:$4 sm:$0xff]  }
 0x4a6   :  { %3274 = vmatprep.subr.bf16.mxu0 %v3803_v44 }
 0x4a7   :  { %3149 = vmatpush3.bf16.msra.mxu1 %v3610_v63 }
 0x4a8   :  { %3150 = vmatprep.subr.bf16.mxu1 %v3611_v1 }
 0x4a9   :  { %3275 = vmatpush3.bf16.msra.mxu0 %v3652_v56  ;;  %v3695_v56 = vld [vmem:[#allocation5 + $0x560] ss:$8 sps:$4 sm:$0xff]  }
 0x4aa   :  { %3276 = vmatprep.subr.bf16.mxu0 %v3803_v44 }
 0x4ab   :  { %3151 = vmatpush3.bf16.msra.mxu1 %v3612_v2 }
 0x4ac   :  { %3152 = vmatprep.subr.bf16.mxu1 %v3613_v3 }
 0x4ad   :  { %3277 = vmatpush3.bf16.msra.mxu0 %v3654_v58  ;;  %v3697_v58 = vld [vmem:[#allocation5 + $0x580] ss:$8 sps:$4 sm:$0xff]  }
 0x4ae   :  { %3302 = vmatprep.subr.bf16.mxu0 %v3803_v44 }
 0x4af   :  { %3153 = vmatpush3.bf16.msra.mxu1 %v3614_v4 }
 0x4b0   :  { %3154 = vmatprep.subr.bf16.mxu1 %v3615_v0 }
 0x4b3   :  { %3155 = vmatpush3.bf16.msra.mxu1 %v3616_v5 }
 0x4b4   :  { %3156 = vmatprep.subr.bf16.mxu1 %v3617_v6 }
 0x4b7   :  { %3157 = vmatpush3.bf16.msra.mxu1 %v3618_v7 }
 0x4b8   :  { %3158 = vmatprep.subr.bf16.mxu1 %v3619_v8 }
 0x4bb   :  { %3159 = vmatpush3.bf16.msra.mxu1 %v3620_v9  ;;  %v3655_v9 = vld [vmem:[#allocation5 + $0x360] ss:$8 sps:$4 sm:$0xff]  }
 0x4bc   :  { %3160 = vmatprep.subr.bf16.mxu1 %v3621_v10 }
 0x4bf   :  { %3161 = vmatpush3.bf16.msra.mxu1 %v3622_v11  ;;  %v3656_v11 = vld [vmem:[#allocation5 + $0x2e0] ss:$8 sps:$4 sm:$0xff]  }
 0x4c0   :  { %3168 = vmatprep.subr.bf16.mxu1 %v3623_v12 }
 0x56d   :  { %v1593_v13 = vpop.f32.mrb[32].mxu1 }
 0x56e   :  { %v1595_v14 = vpop.f32.mrb[33].mxu1 }
 0x56f   :  { %v1597_v15 = vpop.f32.mrb[34].mxu1 }
 0x570   :  { %v1599_v16 = vpop.f32.mrb[35].mxu1 }
 0x575   :  { %v1646_v17 = vpop.f32.mrb[36].mxu1 }
 0x576   :  { %v1655_v18 = vmax.f32 %v1593_v13, %v1646_v17  ;;  %v1648_v19 = vpop.f32.mrb[37].mxu1  ;;  %v3657_v13 = vld [vmem:[#allocation5 + $0x370] ss:$8 sps:$4 sm:$0xff]  }
 0x577   :  { %v1656_v20 = vmax.f32 %v1595_v14, %v1648_v19  ;;  %v1650_v21 = vpop.f32.mrb[38].mxu1  ;;  %v3658_v14 = vld [vmem:[#allocation5 + $0x2f0] ss:$8 sps:$4 sm:$0xff]   ;;  %v3663_v19 = vld [vmem:[#allocation5 + $0x3a0] ss:$8 sps:$4 sm:$0xff]  }
 0x578   :  { %v1657_v22 = vmax.f32 %v1597_v15, %v1650_v21  ;;  %v1652_v23 = vpop.f32.mrb[39].mxu1  ;;  %v3659_v15 = vld [vmem:[#allocation5 + $0x380] ss:$8 sps:$4 sm:$0xff]   ;;  %v3661_v17 = vld [vmem:[#allocation5 + $0x390] ss:$8 sps:$4 sm:$0xff]  }
 0x579   :  { %v1658_v24 = vmax.f32 %v1599_v16, %v1652_v23  ;;  %v3660_v16 = vld [vmem:[#allocation5 + $0x300] ss:$8 sps:$4 sm:$0xff]   ;;  %v3665_v21 = vld [vmem:[#allocation5 + $0x3b0] ss:$8 sps:$4 sm:$0xff]  }
 0x57a   :  { %v1659_v25 = vpack.c.bf16 %v1657_v22, %v1655_v18  ;;  %v3662_v18 = vld [vmem:[#allocation5 + $0x310] ss:$8 sps:$4 sm:$0xff]   ;;  %v3667_v23 = vld [vmem:[#allocation5 + $0x3c0] ss:$8 sps:$4 sm:$0xff]  }
 0x57b   :  { %v1660_v26 = vpack.c.bf16 %v1658_v24, %v1656_v20  ;;  %v3664_v20 = vld [vmem:[#allocation5 + $0x320] ss:$8 sps:$4 sm:$0xff]   ;;  %v3666_v22 = vld [vmem:[#allocation5 + $0x330] ss:$8 sps:$4 sm:$0xff]  }
 0x57c   :  { %v3668_v24 = vld [vmem:[#allocation5 + $0x340] ss:$8 sps:$4 sm:$0xff]  }
 0x57d   :  { %1821 = vmatprep.mubr.bf16.mxu1 %v1660_v26 }
 0x57e   :  { %1822 = vmatmul.mubr.bf16.vlgmr.msra.gmra.mrb[40].mxu1 %v1659_v25 }
 0x57f   :  { %3169 = vmatpush3.bf16.msra.mxu1 %v3624_v27  ;;  %1990 = vmatprep.mubr.bf16.mxu1 %v1660_v26  ;;  %v3670_v26 = vld [vmem:[#allocation5 + $0x350] ss:$8 sps:$4 sm:$0xff]   ;;  %v3671_v27 = vld [vmem:[#allocation5 + $0x460] ss:$8 sps:$4 sm:$0xff]  }
 0x580   :  { %3170 = vmatprep.subr.bf16.mxu1 %v3625_v28 }
 0x583   :  { %3171 = vmatpush3.bf16.msra.mxu1 %v3626_v29  ;;  %v3672_v29 = vld [vmem:[#allocation5 + $0x3e0] ss:$8 sps:$4 sm:$0xff]  }
 0x584   :  { %3172 = vmatprep.subr.bf16.mxu1 %v3627_v30 }
 0x587   :  { %3173 = vmatpush3.bf16.msra.mxu1 %v3628_v31  ;;  %v3673_v31 = vld [vmem:[#allocation5 + $0x470] ss:$8 sps:$4 sm:$0xff]  }
 0x588   :  { %3174 = vmatprep.subr.bf16.mxu1 %v3629_v32  ;;  %v3674_v32 = vld [vmem:[#allocation5 + $0x3f0] ss:$8 sps:$4 sm:$0xff]  }
 0x58b   :  { %3175 = vmatpush3.bf16.msra.mxu1 %v3630_v33  ;;  %v3675_v33 = vld [vmem:[#allocation5 + $0x480] ss:$8 sps:$4 sm:$0xff]  }
 0x58c   :  { %3176 = vmatprep.subr.bf16.mxu1 %v3631_v34  ;;  %v3676_v34 = vld [vmem:[#allocation5 + $0x400] ss:$8 sps:$4 sm:$0xff]  }
 0x58f   :  { %3177 = vmatpush3.bf16.msra.mxu1 %v3632_v35  ;;  %v3677_v35 = vld [vmem:[#allocation5 + $0x490] ss:$8 sps:$4 sm:$0xff]  }
 0x590   :  { %3178 = vmatprep.subr.bf16.mxu1 %v3633_v36  ;;  %v3678_v36 = vld [vmem:[#allocation5 + $0x410] ss:$8 sps:$4 sm:$0xff]  }
 0x593   :  { %3179 = vmatpush3.bf16.msra.mxu1 %v3634_v37  ;;  %v3679_v37 = vld [vmem:[#allocation5 + $0x4a0] ss:$8 sps:$4 sm:$0xff]  }
 0x594   :  { %3180 = vmatprep.subr.bf16.mxu1 %v3635_v38  ;;  %v3680_v38 = vld [vmem:[#allocation5 + $0x420] ss:$8 sps:$4 sm:$0xff]  }
 0x597   :  { %3181 = vmatpush3.bf16.msra.mxu1 %v3636_v39  ;;  %v3681_v39 = vld [vmem:[#allocation5 + $0x4b0] ss:$8 sps:$4 sm:$0xff]  }
 0x598   :  { %3182 = vmatprep.subr.bf16.mxu1 %v3637_v40  ;;  %v3682_v40 = vld [vmem:[#allocation5 + $0x430] ss:$8 sps:$4 sm:$0xff]  }
 0x59b   :  { %3183 = vmatpush3.bf16.msra.mxu1 %v3638_v41  ;;  %v3683_v41 = vld [vmem:[#allocation5 + $0x4c0] ss:$8 sps:$4 sm:$0xff]  }
 0x59c   :  { %3282 = vmatprep.subr.bf16.mxu1 %v3803_v44 }
 0x59e   :  { %1991 = vmatmul.mubr.bf16.vlgmr.msra.gmra.mrb[44].mxu1 %v1659_v25  ;;  %v3669_v25 = vld [vmem:[#allocation5 + $0x3d0] ss:$8 sps:$4 sm:$0xff]  }
 0x59f   :  { %3283 = vmatpush3.bf16.msra.mxu1 %v3639_v42  ;;  %3298 = vmatprep.mubr.msk.bf16.mxu1 %vm3804_vm6, %v3803_v44  ;;  %v3684_v42 = vld [vmem:[#allocation5 + $0x440] ss:$8 sps:$4 sm:$0xff]  }
 0x5a0   :  { %3284 = vmatprep.subr.bf16.mxu1 %v3803_v44 }
 0x5a3   :  { %3285 = vmatpush3.bf16.msra.mxu1 %v3641_v53  ;;  %v3686_v53 = vld [vmem:[#allocation5 + $0x450] ss:$8 sps:$4 sm:$0xff]  }
 0x5a4   :  { %3286 = vmatprep.subr.bf16.mxu1 %v3803_v44 }
 0x5a7   :  { %3287 = vmatpush3.bf16.msra.mxu1 %v3643_v52 }
 0x5a8   :  { %3288 = vmatprep.subr.bf16.mxu1 %v3803_v44 }
 0x5ab   :  { %3289 = vmatpush3.bf16.msra.mxu1 %v3645_v46  ;;  %v3688_v46 = vld [vmem:[#allocation5 + $0x4f0] ss:$8 sps:$4 sm:$0xff]  }
 0x5ac   :  { %3290 = vmatprep.subr.bf16.mxu1 %v3803_v44 }
 0x5af   :  { %3291 = vmatpush3.bf16.msra.mxu1 %v3647_v48  ;;  %v3690_v48 = vld [vmem:[#allocation5 + $0x510] ss:$8 sps:$4 sm:$0xff]  }
 0x5b0   :  { %3292 = vmatprep.subr.bf16.mxu1 %v3803_v44 }
 0x5b3   :  { %3293 = vmatpush3.bf16.msra.mxu1 %v3649_v50  ;;  %v3692_v50 = vld [vmem:[#allocation5 + $0x530] ss:$8 sps:$4 sm:$0xff]  }
 0x5b4   :  { %3294 = vmatprep.subr.bf16.mxu1 %v3803_v44 }
 0x5b7   :  { %3295 = vmatpush3.bf16.msra.mxu1 %v3651_v54  ;;  %v3694_v54 = vld [vmem:[#allocation5 + $0x550] ss:$8 sps:$4 sm:$0xff]  }
 0x5b8   :  { %3296 = vmatprep.subr.bf16.mxu1 %v3803_v44 }
 0x5bb   :  { %3297 = vmatpush3.bf16.msra.mxu1 %v3653_v57  ;;  %v3696_v57 = vld [vmem:[#allocation5 + $0x570] ss:$8 sps:$4 sm:$0xff]  }
 0x5bc   :  { %3322 = vmatprep.subr.bf16.mxu1 %v3803_v44 }
 0x651   :  { %v3162_v59 = vpop.f32.mrb[40].mxu1 }
 0x652   :  { %v3163_v60 = vpop.f32.mrb[41].mxu1 }
 0x653   :  { %v3164_v61 = vadd.f32 %v3163_v60, %v3162_v59  ;;  %v3165_v62 = vpop.f32.mrb[42].mxu1  ;;  %v3698_v59 = vld [vmem:[#allocation5 + $0x590] ss:$8 sps:$4 sm:$0xff]   ;;  %v3699_v60 = vld [vmem:[#allocation5 + $0x5a0] ss:$8 sps:$4 sm:$0xff]  }
 0x654   :  { %v3166_v63 = vpop.f32.mrb[43].mxu1 }
 0x655   :  { %v3167_v1 = vadd.f32 %v3166_v63, %v3165_v62 }
 0x671   :  { %v3184_v2 = vpop.f32.mrb[44].mxu1 }
 0x672   :  { %v3185_v3 = vpop.f32.mrb[45].mxu1 }
 0x673   :  { %v3186_v4 = vadd.f32 %v3185_v3, %v3184_v2  ;;  %v3187_v0 = vpop.f32.mrb[46].mxu1 }
 0x674   :  { %v3188_v5 = vpop.f32.mrb[47].mxu1 }
 0x675   :  { %v1999_v6 = vmax.f32 %v3164_v61, %v3186_v4  ;;  %v3189_v7 = vadd.f32 %v3188_v5, %v3187_v0  ;;  %v3700_v61 = vld [vmem:[#allocation5 + $0x5b0] ss:$8 sps:$4 sm:$0xff]  }
 0x677   :  { %v2000_v8 = vmax.f32 %v3167_v1, %v3189_v7 }
 0x679   :  { %v3979_v10 = vpack.c.bf16 %v2000_v8, %v1999_v6 }
 0x67b   :  { %3299 = vmatmul.mubr.bf16.vlgmr.msra.gmra.mrb[48].mxu1 %v3979_v10  ;;  %v2035_v12 = vrot.slane %v3979_v10, 1  ;;  %v2336_v28 = vrot.slane %v3979_v10, 3  ;;  %v2229_v30 = vrot.slane %v3979_v10, 2  ;;  %v2550_v45 = vrot.slane %v3979_v10, 5 }
 0x67c   :  { %3323 = vmatpush3.bf16.msra.mxu1 %v3655_v9  ;;  %3338 = vmatprep.mubr.msk.bf16.mxu1 %vm3804_vm6, %v3803_v44  ;;  %v2443_v52 = vrot.slane %v3979_v10, 4 }
 0x67d   :  { %3279 = vmatmul.mubr.bf16.vlgmr.msra.gmra.mrb[24].mxu0 %v2035_v12  ;;  %3324 = vmatprep.subr.bf16.mxu1 %v3803_v44 }
 0x67e   :  { %3303 = vmatpush3.bf16.msra.mxu0 %v3656_v11  ;;  %3318 = vmatprep.mubr.msk.bf16.mxu0 %vm3804_vm6, %v3803_v44 }
 0x67f   :  { %3304 = vmatprep.subr.bf16.mxu0 %v3803_v44 }
 0x680   :  { %3325 = vmatpush3.bf16.msra.mxu1 %v3657_v13 }
 0x681   :  { %3326 = vmatprep.subr.bf16.mxu1 %v3803_v44 }
 0x682   :  { %3305 = vmatpush3.bf16.msra.mxu0 %v3658_v14 }
 0x683   :  { %3306 = vmatprep.subr.bf16.mxu0 %v3803_v44 }
 0x684   :  { %3327 = vmatpush3.bf16.msra.mxu1 %v3659_v15 }
 0x685   :  { %3328 = vmatprep.subr.bf16.mxu1 %v3803_v44 }
 0x686   :  { %3307 = vmatpush3.bf16.msra.mxu0 %v3660_v16 }
 0x687   :  { %3308 = vmatprep.subr.bf16.mxu0 %v3803_v44 }
 0x688   :  { %3329 = vmatpush3.bf16.msra.mxu1 %v3661_v17 }
 0x689   :  { %3330 = vmatprep.subr.bf16.mxu1 %v3803_v44 }
 0x68a   :  { %3309 = vmatpush3.bf16.msra.mxu0 %v3662_v18 }
 0x68b   :  { %3310 = vmatprep.subr.bf16.mxu0 %v3803_v44 }
 0x68c   :  { %3331 = vmatpush3.bf16.msra.mxu1 %v3663_v19 }
 0x68d   :  { %3332 = vmatprep.subr.bf16.mxu1 %v3803_v44 }
 0x68e   :  { %3311 = vmatpush3.bf16.msra.mxu0 %v3664_v20 }
 0x68f   :  { %3312 = vmatprep.subr.bf16.mxu0 %v3803_v44 }
 0x690   :  { %3333 = vmatpush3.bf16.msra.mxu1 %v3665_v21 }
 0x691   :  { %3334 = vmatprep.subr.bf16.mxu1 %v3803_v44 }
 0x692   :  { %3313 = vmatpush3.bf16.msra.mxu0 %v3666_v22 }
 0x693   :  { %3314 = vmatprep.subr.bf16.mxu0 %v3803_v44 }
 0x694   :  { %3335 = vmatpush3.bf16.msra.mxu1 %v3667_v23 }
 0x695   :  { %3336 = vmatprep.subr.bf16.mxu1 %v3803_v44 }
 0x696   :  { %3315 = vmatpush3.bf16.msra.mxu0 %v3668_v24  ;;  %v2641_v24 = vld [vmem:[#allocation7 + $0x2] ss:$0 sm:$0xff] }
 0x697   :  { %3316 = vmatprep.subr.bf16.mxu0 %v3803_v44 }
 0x698   :  { %3337 = vmatpush3.bf16.msra.mxu1 %v3669_v25 }
 0x699   :  { %3362 = vmatprep.subr.bf16.mxu1 %v3803_v44 }
 0x69a   :  { %3317 = vmatpush3.bf16.msra.mxu0 %v3670_v26 }
 0x69b   :  { %3339 = vmatmul.mubr.bf16.vlgmr.msra.gmra.mrb[52].mxu1 %v2336_v28  ;;  %3342 = vmatprep.subr.bf16.mxu0 %v3803_v44 }
 0x69c   :  { %3363 = vmatpush3.bf16.msra.mxu1 %v3671_v27  ;;  %3378 = vmatprep.mubr.msk.bf16.mxu1 %vm3804_vm6, %v3803_v44 }
 0x69d   :  { %3319 = vmatmul.mubr.bf16.vlgmr.msra.gmra.mrb[28].mxu0 %v2229_v30  ;;  %3364 = vmatprep.subr.bf16.mxu1 %v3803_v44 }
 0x69e   :  { %3343 = vmatpush3.bf16.msra.mxu0 %v3672_v29  ;;  %3358 = vmatprep.mubr.msk.bf16.mxu0 %vm3804_vm6, %v3803_v44 }
 0x69f   :  { %3344 = vmatprep.subr.bf16.mxu0 %v3803_v44 }
 0x6a0   :  { %3365 = vmatpush3.bf16.msra.mxu1 %v3673_v31  ;;  %v3701_v31 = vld [vmem:[#allocation5 + $0x5c0] ss:$8 sps:$4 sm:$0xff]  }
 0x6a1   :  { %3366 = vmatprep.subr.bf16.mxu1 %v3803_v44 }
 0x6a2   :  { %3345 = vmatpush3.bf16.msra.mxu0 %v3674_v32  ;;  %v3702_v32 = vld [vmem:[#allocation5 + $0x5d0] ss:$8 sps:$4 sm:$0xff]  }
 0x6a3   :  { %3346 = vmatprep.subr.bf16.mxu0 %v3803_v44 }
 0x6a4   :  { %3367 = vmatpush3.bf16.msra.mxu1 %v3675_v33  ;;  %v2661_v33 = vld [vmem:[#allocation7 + $0x3] ss:$0 sm:$0xff] }
 0x6a5   :  { %3368 = vmatprep.subr.bf16.mxu1 %v3803_v44 }
 0x6a6   :  { %3347 = vmatpush3.bf16.msra.mxu0 %v3676_v34 }
 0x6a7   :  { %3348 = vmatprep.subr.bf16.mxu0 %v3803_v44 }
 0x6a8   :  { %3369 = vmatpush3.bf16.msra.mxu1 %v3677_v35 }
 0x6a9   :  { %3370 = vmatprep.subr.bf16.mxu1 %v3803_v44 }
 0x6aa   :  { %3349 = vmatpush3.bf16.msra.mxu0 %v3678_v36 }
 0x6ab   :  { %3350 = vmatprep.subr.bf16.mxu0 %v3803_v44 }
 0x6ac   :  { %3371 = vmatpush3.bf16.msra.mxu1 %v3679_v37 }
 0x6ad   :  { %3372 = vmatprep.subr.bf16.mxu1 %v3803_v44 }
 0x6ae   :  { %3351 = vmatpush3.bf16.msra.mxu0 %v3680_v38 }
 0x6af   :  { %3352 = vmatprep.subr.bf16.mxu0 %v3803_v44 }
 0x6b0   :  { %3373 = vmatpush3.bf16.msra.mxu1 %v3681_v39 }
 0x6b1   :  { %3374 = vmatprep.subr.bf16.mxu1 %v3803_v44 }
 0x6b2   :  { %3353 = vmatpush3.bf16.msra.mxu0 %v3682_v40 }
 0x6b3   :  { %3354 = vmatprep.subr.bf16.mxu0 %v3803_v44 }
 0x6b4   :  { %3375 = vmatpush3.bf16.msra.mxu1 %v3683_v41  ;;  %v2768_v41 = vld [vmem:[#allocation7 + $0x4] ss:$0 sm:$0xff] }
 0x6b5   :  { %3376 = vmatprep.subr.bf16.mxu1 %v3803_v44 }
 0x6b6   :  { %3355 = vmatpush3.bf16.msra.mxu0 %v3684_v42 }
 0x6b7   :  { %3356 = vmatprep.subr.bf16.mxu0 %v3803_v44 }
 0x6b8   :  { %3377 = vmatpush3.bf16.msra.mxu1 %v3685_v43 }
 0x6b9   :  { %3402 = vmatprep.subr.bf16.mxu1 %v3803_v44 }
 0x6ba   :  { %3357 = vmatpush3.bf16.msra.mxu0 %v3686_v53 }
 0x6bb   :  { %3379 = vmatmul.mubr.bf16.vlgmr.msra.gmra.mrb[56].mxu1 %v2550_v45  ;;  %3382 = vmatprep.subr.bf16.mxu0 %v3803_v44 }
 0x6bc   :  { %3418 = vmatprep.mubr.msk.bf16.mxu1 %vm3804_vm6, %v3803_v44  ;;  %3403 = vmatpush3.bf16.msra.mxu1 %v3695_v56 }
 0x6bd   :  { %3359 = vmatmul.mubr.bf16.vlgmr.msra.gmra.mrb[32].mxu0 %v2443_v52  ;;  %3404 = vmatprep.subr.bf16.mxu1 %v3803_v44 }
 0x6be   :  { %3398 = vmatprep.mubr.msk.bf16.mxu0 %vm3804_vm6, %v3803_v44  ;;  %3383 = vmatpush3.bf16.msra.mxu0 %v3687_v55 }
 0x6bf   :  { %3384 = vmatprep.subr.bf16.mxu0 %v3803_v44 }
 0x6c0   :  { %3405 = vmatpush3.bf16.msra.mxu1 %v3696_v57 }
 0x6c1   :  { %3406 = vmatprep.subr.bf16.mxu1 %v3803_v44 }
 0x6c2   :  { %3385 = vmatpush3.bf16.msra.mxu0 %v3688_v46 }
 0x6c3   :  { %3386 = vmatprep.subr.bf16.mxu0 %v3803_v44 }
 0x6c4   :  { %3407 = vmatpush3.bf16.msra.mxu1 %v3697_v58 }
 0x6c5   :  { %3408 = vmatprep.subr.bf16.mxu1 %v3803_v44 }
 0x6c6   :  { %3387 = vmatpush3.bf16.msra.mxu0 %v3689_v47 }
 0x6c7   :  { %3388 = vmatprep.subr.bf16.mxu0 %v3803_v44 }
 0x6c8   :  { %3409 = vmatpush3.bf16.msra.mxu1 %v3698_v59 }
 0x6c9   :  { %3410 = vmatprep.subr.bf16.mxu1 %v3803_v44 }
 0x6ca   :  { %3389 = vmatpush3.bf16.msra.mxu0 %v3690_v48 }
 0x6cb   :  { %3390 = vmatprep.subr.bf16.mxu0 %v3803_v44 }
 0x6cc   :  { %3411 = vmatpush3.bf16.msra.mxu1 %v3699_v60 }
 0x6cd   :  { %3412 = vmatprep.subr.bf16.mxu1 %v3803_v44 }
 0x6ce   :  { %3391 = vmatpush3.bf16.msra.mxu0 %v3691_v49 }
 0x6cf   :  { %3392 = vmatprep.subr.bf16.mxu0 %v3803_v44 }
 0x6d0   :  { %3413 = vmatpush3.bf16.msra.mxu1 %v3700_v61 }
 0x6d1   :  { %3414 = vmatprep.subr.bf16.mxu1 %v3803_v44 }
 0x6d2   :  { %3393 = vmatpush3.bf16.msra.mxu0 %v3692_v50 }
 0x6d3   :  { %3394 = vmatprep.subr.bf16.mxu0 %v3803_v44 }
 0x6d4   :  { %3415 = vmatpush3.bf16.msra.mxu1 %v3701_v31 }
 0x6d5   :  { %3416 = vmatprep.subr.bf16.mxu1 %v3803_v44 }
 0x6d6   :  { %3395 = vmatpush3.bf16.msra.mxu0 %v3693_v51 }
 0x6d7   :  { %3396 = vmatprep.subr.bf16.mxu0 %v3803_v44 }
 0x6d8   :  { %3417 = vmatpush3.bf16.msra.mxu1 %v3702_v32 }
 0x6da   :  { %3397 = vmatpush3.bf16.msra.mxu0 %v3694_v54 }
 0x74e   :  { %v2207_v62 = vpop.f32.mrb[48].mxu1 }
 0x74f   :  { %v3300_v63 = vpop.f32.mrb[49].mxu1 }
 0x750   :  { %v2119_v1 = vpop.f32.mrb[24].mxu0  ;;  %v2210_v2 = vpop.f32.mrb[50].mxu1 }
 0x751   :  { %v2208_v3 = vadd.f32 %v2207_v62, %v2119_v1  ;;  %v3280_v4 = vpop.f32.mrb[25].mxu0  ;;  %v3301_v0 = vpop.f32.mrb[51].mxu1 }
 0x752   :  { %v2122_v5 = vpop.f32.mrb[26].mxu0 }
 0x753   :  { %v3281_v6 = vpop.f32.mrb[27].mxu0 }
 0x76e   :  { %v2420_v7 = vpop.f32.mrb[52].mxu1 }
 0x76f   :  { %v3340_v8 = vpop.f32.mrb[53].mxu1 }
 0x770   :  { %v2313_v9 = vpop.f32.mrb[28].mxu0  ;;  %v2423_v10 = vpop.f32.mrb[54].mxu1 }
 0x771   :  { %v2319_v11 = vadd.f32 %v2313_v9, %v2208_v3  ;;  %v3320_v12 = vpop.f32.mrb[29].mxu0  ;;  %v3341_v13 = vpop.f32.mrb[55].mxu1 }
 0x772   :  { %v2316_v14 = vpop.f32.mrb[30].mxu0 }
 0x773   :  { %v3321_v15 = vpop.f32.mrb[31].mxu0  ;;  %v2426_v16 = vadd.f32 %v2420_v7, %v2319_v11 }
 0x78e   :  { %v2634_v17 = vpop.f32.mrb[56].mxu1 }
 0x78f   :  { %v3380_v18 = vpop.f32.mrb[57].mxu1 }
 0x790   :  { %v2527_v19 = vpop.f32.mrb[32].mxu0  ;;  %v2637_v20 = vpop.f32.mrb[58].mxu1 }
 0x791   :  { %v2533_v21 = vadd.f32 %v2527_v19, %v2426_v16  ;;  %v3360_v22 = vpop.f32.mrb[33].mxu0  ;;  %v3381_v23 = vpop.f32.mrb[59].mxu1 }
 0x792   :  { %v2530_v25 = vpop.f32.mrb[34].mxu0 }
 0x793   :  { %v2640_v26 = vadd.f32 %v2634_v17, %v2533_v21  ;;  %v3361_v27 = vpop.f32.mrb[35].mxu0 }
 0x795   :  { %v2642_v28 = vadd.f32 %v2641_v24, %v2640_v26 }
 0x797   :  { %v2643_v29 = vmax.f32 %v2642_v28, 0.0 }
 0x799   :  { %v2644_v30 = vpack.c.bf16 %v2643_v29, %v2643_v29 }
 0x79b   :  { %3399 = vmatmul.mubr.bf16.vlgmr.msra.gmra.mrb[36].mxu0 %v2644_v30 }
 0x86e   :  { %v2744_v34 = vpop.f32.mrb[36].mxu0 }
 0x86f   :  { %v2745_v35 = vadd.f32 %v2744_v34, %v2661_v33  ;;  %v3400_v36 = vpop.f32.mrb[37].mxu0 }
 0x870   :  { %v2747_v37 = vpop.f32.mrb[38].mxu0 }
 0x871   :  { %v2750_v38 = vmax.f32 %v2745_v35, 0.0  ;;  %v3401_v39 = vpop.f32.mrb[39].mxu0 }
 0x873   :  { %v2751_v40 = vpack.c.bf16 %v2750_v38, %v2750_v38 }
 0x875   :  { %3419 = vmatmul.mubr.bf16.vlgmr.msra.gmra.mrb[60].mxu1 %v2751_v40 }
 0x948   :  { %v2851_v42 = vpop.f32.mrb[60].mxu1 }
 0x949   :  { %v2852_v43 = vadd.f32 %v2851_v42, %v2768_v41  ;;  %v3420_v53 = vpop.f32.mrb[61].mxu1 }
 0x94a   :  { %v2854_v45 = vpop.f32.mrb[62].mxu1 }
 0x94b   :  { %2857 = vst [vmem:[#allocation8] sm:$0x3] %v2852_v43  ;;  %v3421_v44 = vpop.f32.mrb[63].mxu1 }
 0x94c   :  { %3780 = shalt.err (!%p3777_p0)
}
 0x94d   :  { %s3781_s25 = scalar_lea.hbm %s4060_s3, 32 }
 0x94e   :  { %p3782_p1 = scmp.ne.s32.totalorder %s4060_s3, %s3781_s25  ;;  %p3785_p2 = scmp.lt.u32.totalorder %s3781_s25, %s4060_s3 }
 0x950   :  { %p3787_p3 = pnand %p3785_p2, %p3782_p1 }
 0x952   :  { %3790 = shalt.err (!%p3787_p3)
}
 0x953   :  { %2867 = dma.vmem_to_hbm [thread:$0]  %s2865_s21, 32, %s4060_s3, [#allocation4]  }
 0x954   :  { %3795 = dma.done.wait [#allocation4], 32  }
 0x955   :  { %3796 = vsyncadd [#allocation4], 4294967264 }
 0x956   :  { %2871 = vsyncpa [#allocation3], 1 }
 0x957   :  { %2872 = vsyncpa [#allocation6], 1 }
 0x958   :  { %2873 = vsyncpa [#allocation4], 1 }

</bundles_post_ra>
